<compile_context>
chip_gen: v5e
topology: v5e:2x2
jax: 0.10.0
libtpu: 0.0.40
codegen_flags: <defaults>
</compile_context>

<pallas_src>
import functools

import jax
import jax.numpy as jnp
from jax import lax
from jax.experimental import pallas as pl
from jax.experimental.pallas import tpu as pltpu

HIDDEN = 512  # fixed by the module definition


def _rpn_kernel(xm_ref, xt_ref, xb_ref, wconv_ref, bconv_ref, wh_ref, bh_ref,
                out_ref, *, strip_rows, W, Cin, halo_rows):
    """One (batch, row-strip) grid step.

    xm_ref    : (1, Cin, TH*W)      strip rows, spatial flattened on lanes
    xt_ref    : (1, Cin, HB, W)     8-row block containing the top halo row
    xb_ref    : (1, Cin, HB, W)     8-row block containing the bottom halo row
    wconv_ref : (512, 9*Cin)        conv3x3 weight^T, col = (ky*3+kx)*Cin + c
    bconv_ref : (512, 1)            f32
    wh_ref    : (A2+A4, 512)        fused + transposed 1x1 head weights
    bh_ref    : (A2+A4, 1)          f32
    out_ref   : (1, A2+A4, TH*W)    fused lane-dense output
    """
    TH = strip_rows
    s = pl.program_id(1)
    last = pl.num_programs(1) - 1

    xm = xm_ref[0]                                           # (Cin, TH*W) f32
    # Halo rows; zeroed when they fall outside the image (-> conv's H pad).
    top = jnp.where(s > 0, xt_ref[0][:, halo_rows - 1, :], 0.0)   # (Cin, W)
    bot = jnp.where(s < last, xb_ref[0][:, 0, :], 0.0)            # (Cin, W)

    # Strip + halo rows flattened on lanes, with one zero guard lane on each
    # side so every (ky, kx) tap below is a static lane slice.
    #   xpad[c, 1 + r*W + w] = x[c, s*TH - 1 + r, w]   (out-of-image rows = 0)
    zguard = jnp.zeros((Cin, 1), xm.dtype)
    xpad = jnp.concatenate([zguard, top, xm, bot, zguard], axis=-1)

    # Border masks for the +/-1 W shifts (the conv's W padding).
    col = lax.broadcasted_iota(jnp.int32, (1, TH * W), 1) % W
    not_first_col = col != 0
    not_last_col = col != (W - 1)

    # Transposed im2col: row (ky*3 + kx)*Cin + c of `patches` holds
    # x[c, h+ky-1, w+kx-1] over the TH*W strip positions (lane axis).
    pieces = []
    for ky in range(3):
        base = ky * W
        left = xpad[:, base:base + TH * W]                   # w-1 tap
        mid = xpad[:, base + 1:base + 1 + TH * W]            # w   tap
        right = xpad[:, base + 2:base + 2 + TH * W]          # w+1 tap
        pieces.append(jnp.where(not_first_col, left, 0.0))
        pieces.append(mid)
        pieces.append(jnp.where(not_last_col, right, 0.0))
    patches = jnp.concatenate(pieces, axis=0)                # (9*Cin, TH*W)

    # conv3x3 as one deep-K MXU matmul (f32 accumulation) + bias + ReLU.
    feat_t = jnp.dot(wconv_ref[...], patches.astype(wconv_ref.dtype),
                     preferred_element_type=jnp.float32)     # (512, TH*W)
    feat_t = jnp.maximum(feat_t + bconv_ref[...], 0.0)

    # Fused cls/bbox 1x1 heads.  M = A2+A4 (18) rows -> low MXU row
    # utilization; amortized over the lane-dense TH*W strip (see review).
    heads = jnp.dot(wh_ref[...], feat_t.astype(wh_ref.dtype),
                    preferred_element_type=jnp.float32)      # (A2+A4, TH*W)
    out_ref[0] = (heads + bh_ref[...]).astype(out_ref.dtype)


def _pick_strip_rows(H, W, strip_rows):
    """Clamp/validate the strip height.

    Multi-strip mode needs H % TH == 0, TH % 8 == 0 (so the halo row sits at
    a fixed position inside its 8-row fetch block) and (TH*W) % 128 == 0
    (lane-dense blocks).  Anything else falls back to a single full-image
    strip, which is always legal (block == full array dims).
    """
    if strip_rows is None:
        strip_rows = 8
    th = min(int(strip_rows), H)
    if H % th != 0:
        return H
    if H // th > 1 and (th % 8 != 0 or (th * W) % 128 != 0):
        return H
    return th


def rpn_forward(x_nchw, params, *, compute_dtype=jnp.float32, strip_rows=8):
    """Pallas RPN forward.  x_nchw: (B, Cin, H, W) float32.

    Returns (logits, bbox_reg) in NCHW: (B, A*2, H, W), (B, A*4, H, W).

    `compute_dtype=jnp.bfloat16` runs both matmuls in bf16 with f32
    accumulation (valid on v5e/v6e/v7x: the MXU is bf16-native on all of
    them; bias/ReLU math stays f32).  Note this also narrows the im2col
    activations, not just the weights.

    `strip_rows` is the number of output rows per grid step; pick the largest
    strip whose footprint (2x input strip + weights + feat) fits the VMEM
    budget (v6e/v5e allow much larger strips than v7x's 64 MiB).
    """
    B, Cin, H, W = x_nchw.shape
    A2 = params["wcls"].shape[-1]
    A4 = params["wbox"].shape[-1]
    AO = A2 + A4

    TH = _pick_strip_rows(H, W, strip_rows)
    NS = H // TH
    HB = 8 if H >= 8 else H            # halo-fetch block height
    RB = max(TH // HB, 1)              # halo blocks per strip (exact if NS>1)

    # Free, contiguous view with the spatial axis flattened onto lanes.
    x_flat = x_nchw.reshape(B, Cin, H * W)

    # Weight packing (once, outside the kernel), transposed so the kernel
    # contracts over sublanes and keeps the spatial axis on lanes:
    #   wconv_t : (512, 9*Cin)   column = (ky*3 + kx)*Cin + c
    #   wheads  : (A2+A4, 512)   fused cls/bbox head
    wconv_t = params["wconv"].reshape(9 * Cin, HIDDEN).T.astype(compute_dtype)
    wheads = jnp.concatenate([params["wcls"], params["wbox"]], axis=1).T
    wheads = wheads.astype(compute_dtype)                          # (AO, 512)
    bconv = params["bconv"].reshape(HIDDEN, 1).astype(jnp.float32)
    bheads = jnp.concatenate([params["bcls"], params["bbox"]],
                             axis=1).reshape(AO, 1).astype(jnp.float32)

    kernel = functools.partial(_rpn_kernel, strip_rows=TH, W=W, Cin=Cin,
                               halo_rows=HB)

    def top_map(b, s):      # block holding global row s*TH - 1 (clamped)
        return (b, 0, jnp.maximum(s * RB - 1, 0), 0)

    def bot_map(b, s):      # block holding global row s*TH + TH (clamped)
        return (b, 0, jnp.minimum((s + 1) * RB, H // HB - 1), 0)

    grid_spec = pltpu.PrefetchScalarGridSpec(
        num_scalar_prefetch=0,
        grid=(B, NS),
        in_specs=[
            pl.BlockSpec((1, Cin, TH * W), lambda b, s: (b, 0, s)),
            pl.BlockSpec((1, Cin, HB, W), top_map),
            pl.BlockSpec((1, Cin, HB, W), bot_map),
            # Weights / biases: constant index maps -> fetched once, resident.
            pl.BlockSpec((HIDDEN, 9 * Cin), lambda b, s: (0, 0)),
            pl.BlockSpec((HIDDEN, 1), lambda b, s: (0, 0)),
            pl.BlockSpec((AO, HIDDEN), lambda b, s: (0, 0)),
            pl.BlockSpec((AO, 1), lambda b, s: (0, 0)),
        ],
        out_specs=pl.BlockSpec((1, AO, TH * W), lambda b, s: (b, 0, s)),
    )

    fused = pl.pallas_call(
        kernel,
        out_shape=jax.ShapeDtypeStruct((B, AO, H * W), jnp.float32),
        grid_spec=grid_spec,
        compiler_params=pltpu.CompilerParams(
            dimension_semantics=("parallel", "parallel"),
            vmem_limit_bytes=32 * 1024 * 1024),
    )(x_flat, x_nchw, x_nchw, wconv_t, bconv, wheads, bheads)

    # HBM-level split + free contiguous reshape back to NCHW.
    logits = fused[:, :A2, :].reshape(B, A2, H, W)
    bbox_reg = fused[:, A2:, :].reshape(B, A4, H, W)
    return logits, bbox_reg


def init_params(key, in_channels, num_anchors):
    """Deterministic synthetic parameters (shapes from the module __init__)."""
    ks = jax.random.split(key, 6)
    return {
        # conv3x3 weights stored HWIO: (3, 3, Cin, 512)
        "wconv": 0.05 * jax.random.normal(ks[0], (3, 3, in_channels, HIDDEN),
                                          jnp.float32),
        "bconv": 0.01 * jax.random.normal(ks[1], (1, HIDDEN), jnp.float32),
        # 1x1 conv heads stored as dense matrices (Cin, Cout)
        "wcls": 0.05 * jax.random.normal(ks[2], (HIDDEN, num_anchors * 2),
                                         jnp.float32),
        "bcls": 0.01 * jax.random.normal(ks[3], (1, num_anchors * 2),
                                         jnp.float32),
        "wbox": 0.05 * jax.random.normal(ks[4], (HIDDEN, num_anchors * 4),
                                         jnp.float32),
        "bbox": 0.01 * jax.random.normal(ks[5], (1, num_anchors * 4),
                                         jnp.float32),
    }


def rpn_reference(x_nchw, params):
    """Pure-JAX reference (XLA conv) for correctness checking."""
    x = jnp.transpose(x_nchw, (0, 2, 3, 1))  # NHWC
    feat = lax.conv_general_dilated(
        x, params["wconv"], window_strides=(1, 1), padding="SAME",
        dimension_numbers=("NHWC", "HWIO", "NHWC"))
    feat = jnp.maximum(feat + params["bconv"].reshape(1, 1, 1, -1), 0.0)
    logits = jnp.einsum("bhwc,cd->bhwd", feat, params["wcls"]) \
        + params["bcls"].reshape(1, 1, 1, -1)
    box = jnp.einsum("bhwc,cd->bhwd", feat, params["wbox"]) \
        + params["bbox"].reshape(1, 1, 1, -1)
    return (jnp.transpose(logits, (0, 3, 1, 2)),
            jnp.transpose(box, (0, 3, 1, 2)))


if __name__ == "__main__":
    B, Cin, H, W = 2, 4, 16, 16
    num_anchors = 3

    key = jax.random.PRNGKey(0)
    k_x, k_p = jax.random.split(key)
    x = jax.random.normal(k_x, (B, Cin, H, W), jnp.float32)
    params = init_params(k_p, Cin, num_anchors)

    ref_logits, ref_bbox = jax.block_until_ready(rpn_reference(x, params))

    # f32, 8-row strips (grid = (B, 2)): tight tolerance vs the XLA reference.
    logits, bbox_reg = jax.block_until_ready(rpn_forward(x, params))
    assert logits.shape == (B, num_anchors * 2, H, W)
    assert bbox_reg.shape == (B, num_anchors * 4, H, W)
    assert jnp.allclose(logits, ref_logits, atol=1e-3, rtol=1e-3)
    assert jnp.allclose(bbox_reg, ref_bbox, atol=1e-3, rtol=1e-3)

    # Single full-image strip (exercises the halo-discard / fallback path).
    logits1, bbox1 = jax.block_until_ready(
        rpn_forward(x, params, strip_rows=H))
    assert jnp.allclose(logits1, ref_logits, atol=1e-3, rtol=1e-3)
    assert jnp.allclose(bbox1, ref_bbox, atol=1e-3, rtol=1e-3)

    # bf16 matmul path (f32 accumulation): loose tolerance.
    logits16, bbox16 = jax.block_until_ready(
        rpn_forward(x, params, compute_dtype=jnp.bfloat16))
    assert jnp.allclose(logits16, ref_logits, atol=5e-2, rtol=5e-2)
    assert jnp.allclose(bbox16, ref_bbox, atol=5e-2, rtol=5e-2)

    print("KERNEL_OK")
</pallas_src>

<mosaic_0001>
module attributes {stable_mosaic.version = 11 : i64} {
  func.func @_rpn_kernel(%arg0: i32, %arg1: i32, %arg2: memref<1x4x128xf32, #tpu.memory_space<vmem>>, %arg3: memref<1x4x8x16xf32, #tpu.memory_space<vmem>>, %arg4: memref<1x4x8x16xf32, #tpu.memory_space<vmem>>, %arg5: memref<512x36xf32, #tpu.memory_space<vmem>>, %arg6: memref<512x1xf32, #tpu.memory_space<vmem>>, %arg7: memref<18x512xf32, #tpu.memory_space<vmem>>, %arg8: memref<18x1xf32, #tpu.memory_space<vmem>>, %arg9: memref<1x18x128xf32, #tpu.memory_space<vmem>>) attributes {dimension_semantics = [#tpu.dimension_semantics<parallel>, #tpu.dimension_semantics<parallel>], iteration_bounds = array<i64: 2, 2>, scalar_prefetch = 0 : i64, scratch_operands = 0 : i64, tpu.core_type = #tpu.core_type<tc>, window_params = [{transform_indices = @transform_0, window_bounds = array<i64: 1, 4, 128>}, {transform_indices = @transform_1, window_bounds = array<i64: 1, 4, 8, 16>}, {transform_indices = @transform_2, window_bounds = array<i64: 1, 4, 8, 16>}, {pipeline_mode = #tpu.pipeline_mode<synchronous>, transform_indices = @transform_3, window_bounds = array<i64: 512, 36>}, {pipeline_mode = #tpu.pipeline_mode<synchronous>, transform_indices = @transform_4, window_bounds = array<i64: 512, 1>}, {pipeline_mode = #tpu.pipeline_mode<synchronous>, transform_indices = @transform_5, window_bounds = array<i64: 18, 512>}, {pipeline_mode = #tpu.pipeline_mode<synchronous>, transform_indices = @transform_6, window_bounds = array<i64: 18, 1>}, {transform_indices = @transform_7, window_bounds = array<i64: 1, 18, 128>}]} {
    %c0 = arith.constant 0 : index
    %c0_0 = arith.constant 0 : index
    %c0_1 = arith.constant 0 : index
    %0 = vector.load %arg2[%c0, %c0_0, %c0_1] : memref<1x4x128xf32, #tpu.memory_space<vmem>>, vector<1x4x128xf32>
    %1 = vector.shape_cast %0 : vector<1x4x128xf32> to vector<4x128xf32>
    %c0_i32 = arith.constant 0 : i32
    %2 = arith.cmpi sgt, %arg1, %c0_i32 : i32
    %c0_2 = arith.constant 0 : index
    %c0_3 = arith.constant 0 : index
    %c0_4 = arith.constant 0 : index
    %c0_5 = arith.constant 0 : index
    %3 = vector.load %arg3[%c0_2, %c0_3, %c0_4, %c0_5] : memref<1x4x8x16xf32, #tpu.memory_space<vmem>>, vector<1x4x8x16xf32>
    %4 = vector.shape_cast %3 : vector<1x4x8x16xf32> to vector<4x8x16xf32>
    %5 = vector.extract_strided_slice %4 {offsets = [0, 7, 0], sizes = [4, 1, 16], strides = [1, 1, 1]} : vector<4x8x16xf32> to vector<4x1x16xf32>
    %6 = vector.shape_cast %5 : vector<4x1x16xf32> to vector<4x16xf32>
    %cst = arith.constant 0.000000e+00 : f32
    %7 = vector.broadcast %cst : f32 to vector<4x16xf32>
    %8 = arith.select %2, %6, %7 : vector<4x16xf32>
    %c1_i32 = arith.constant 1 : i32
    %9 = arith.cmpi slt, %arg1, %c1_i32 : i32
    %c0_6 = arith.constant 0 : index
    %c0_7 = arith.constant 0 : index
    %c0_8 = arith.constant 0 : index
    %c0_9 = arith.constant 0 : index
    %10 = vector.load %arg4[%c0_6, %c0_7, %c0_8, %c0_9] : memref<1x4x8x16xf32, #tpu.memory_space<vmem>>, vector<1x4x8x16xf32>
    %11 = vector.shape_cast %10 : vector<1x4x8x16xf32> to vector<4x8x16xf32>
    %12 = vector.extract_strided_slice %11 {offsets = [0, 0, 0], sizes = [4, 1, 16], strides = [1, 1, 1]} : vector<4x8x16xf32> to vector<4x1x16xf32>
    %13 = vector.shape_cast %12 : vector<4x1x16xf32> to vector<4x16xf32>
    %cst_10 = arith.constant 0.000000e+00 : f32
    %14 = vector.broadcast %cst_10 : f32 to vector<4x16xf32>
    %15 = arith.select %9, %13, %14 : vector<4x16xf32>
    %cst_11 = arith.constant 0.000000e+00 : f32
    %16 = vector.broadcast %cst_11 : f32 to vector<4x1xf32>
    %17 = tpu.concatenate %16, %8, %1, %15, %16 in 1 : vector<4x1xf32>, vector<4x16xf32>, vector<4x128xf32>, vector<4x16xf32>, vector<4x1xf32> -> vector<4x162xf32>
    %18 = tpu.iota {dimensions = array<i32: 1>} : vector<1x128xi32>
    %c16_i32 = arith.constant 16 : i32
    %c0_i32_12 = arith.constant 0 : i32
    %19 = arith.cmpi eq, %c16_i32, %c0_i32_12 : i32
    %c1_i32_13 = arith.constant 1 : i32
    %20 = arith.select %19, %c1_i32_13, %c16_i32 : i32
    %21 = vector.broadcast %20 : i32 to vector<1x128xi32>
    %22 = arith.remsi %18, %21 : vector<1x128xi32>
    %c0_i32_14 = arith.constant 0 : i32
    %23 = vector.broadcast %c0_i32_14 : i32 to vector<1x128xi32>
    %24 = arith.cmpi ne, %22, %23 : vector<1x128xi32>
    %c0_i32_15 = arith.constant 0 : i32
    %25 = vector.broadcast %c0_i32_15 : i32 to vector<1x128xi32>
    %26 = arith.cmpi slt, %22, %25 : vector<1x128xi32>
    %c0_i32_16 = arith.constant 0 : i32
    %27 = arith.cmpi slt, %20, %c0_i32_16 : i32
    %28 = vector.broadcast %27 : i1 to vector<1x128xi1>
    %29 = vector.broadcast %28 : vector<1x128xi1> to vector<1x128xi1>
    %30 = arith.xori %26, %29 : vector<1x128xi1>
    %31 = arith.andi %30, %24 : vector<1x128xi1>
    %32 = vector.broadcast %20 : i32 to vector<1x128xi32>
    %33 = arith.addi %22, %32 : vector<1x128xi32>
    %34 = arith.select %31, %33, %22 : vector<1x128xi1>, vector<1x128xi32>
    %c0_i32_17 = arith.constant 0 : i32
    %35 = vector.broadcast %c0_i32_17 : i32 to vector<1x128xi32>
    %36 = arith.cmpi ne, %34, %35 : vector<1x128xi32>
    %c15_i32 = arith.constant 15 : i32
    %37 = vector.broadcast %c15_i32 : i32 to vector<1x128xi32>
    %38 = arith.cmpi ne, %34, %37 : vector<1x128xi32>
    %39 = vector.extract_strided_slice %17 {offsets = [0, 0], sizes = [4, 128], strides = [1, 1]} : vector<4x162xf32> to vector<4x128xf32>
    %40 = vector.extract_strided_slice %17 {offsets = [0, 1], sizes = [4, 128], strides = [1, 1]} : vector<4x162xf32> to vector<4x128xf32>
    %41 = vector.extract_strided_slice %17 {offsets = [0, 2], sizes = [4, 128], strides = [1, 1]} : vector<4x162xf32> to vector<4x128xf32>
    %cst_18 = arith.constant 0.000000e+00 : f32
    %42 = vector.shape_cast %36 : vector<1x128xi1> to vector<1x128xi1>
    %43 = vector.broadcast %42 : vector<1x128xi1> to vector<4x128xi1>
    %44 = vector.broadcast %cst_18 : f32 to vector<4x128xf32>
    %45 = arith.select %43, %39, %44 : vector<4x128xi1>, vector<4x128xf32>
    %cst_19 = arith.constant 0.000000e+00 : f32
    %46 = vector.shape_cast %38 : vector<1x128xi1> to vector<1x128xi1>
    %47 = vector.broadcast %46 : vector<1x128xi1> to vector<4x128xi1>
    %48 = vector.broadcast %cst_19 : f32 to vector<4x128xf32>
    %49 = arith.select %47, %41, %48 : vector<4x128xi1>, vector<4x128xf32>
    %50 = vector.extract_strided_slice %17 {offsets = [0, 16], sizes = [4, 128], strides = [1, 1]} : vector<4x162xf32> to vector<4x128xf32>
    %51 = vector.extract_strided_slice %17 {offsets = [0, 17], sizes = [4, 128], strides = [1, 1]} : vector<4x162xf32> to vector<4x128xf32>
    %52 = vector.extract_strided_slice %17 {offsets = [0, 18], sizes = [4, 128], strides = [1, 1]} : vector<4x162xf32> to vector<4x128xf32>
    %cst_20 = arith.constant 0.000000e+00 : f32
    %53 = vector.shape_cast %36 : vector<1x128xi1> to vector<1x128xi1>
    %54 = vector.broadcast %53 : vector<1x128xi1> to vector<4x128xi1>
    %55 = vector.broadcast %cst_20 : f32 to vector<4x128xf32>
    %56 = arith.select %54, %50, %55 : vector<4x128xi1>, vector<4x128xf32>
    %cst_21 = arith.constant 0.000000e+00 : f32
    %57 = vector.shape_cast %38 : vector<1x128xi1> to vector<1x128xi1>
    %58 = vector.broadcast %57 : vector<1x128xi1> to vector<4x128xi1>
    %59 = vector.broadcast %cst_21 : f32 to vector<4x128xf32>
    %60 = arith.select %58, %52, %59 : vector<4x128xi1>, vector<4x128xf32>
    %61 = vector.extract_strided_slice %17 {offsets = [0, 32], sizes = [4, 128], strides = [1, 1]} : vector<4x162xf32> to vector<4x128xf32>
    %62 = vector.extract_strided_slice %17 {offsets = [0, 33], sizes = [4, 128], strides = [1, 1]} : vector<4x162xf32> to vector<4x128xf32>
    %63 = vector.extract_strided_slice %17 {offsets = [0, 34], sizes = [4, 128], strides = [1, 1]} : vector<4x162xf32> to vector<4x128xf32>
    %cst_22 = arith.constant 0.000000e+00 : f32
    %64 = vector.shape_cast %36 : vector<1x128xi1> to vector<1x128xi1>
    %65 = vector.broadcast %64 : vector<1x128xi1> to vector<4x128xi1>
    %66 = vector.broadcast %cst_22 : f32 to vector<4x128xf32>
    %67 = arith.select %65, %61, %66 : vector<4x128xi1>, vector<4x128xf32>
    %cst_23 = arith.constant 0.000000e+00 : f32
    %68 = vector.shape_cast %38 : vector<1x128xi1> to vector<1x128xi1>
    %69 = vector.broadcast %68 : vector<1x128xi1> to vector<4x128xi1>
    %70 = vector.broadcast %cst_23 : f32 to vector<4x128xf32>
    %71 = arith.select %69, %63, %70 : vector<4x128xi1>, vector<4x128xf32>
    %72 = tpu.concatenate %45, %40, %49, %56, %51, %60, %67, %62, %71 in 0 : vector<4x128xf32>, vector<4x128xf32>, vector<4x128xf32>, vector<4x128xf32>, vector<4x128xf32>, vector<4x128xf32>, vector<4x128xf32>, vector<4x128xf32>, vector<4x128xf32> -> vector<36x128xf32>
    %c0_24 = arith.constant 0 : index
    %c0_25 = arith.constant 0 : index
    %73 = vector.load %arg5[%c0_24, %c0_25] : memref<512x36xf32, #tpu.memory_space<vmem>>, vector<512x36xf32>
    %cst_26 = arith.constant dense<0.000000e+00> : vector<512x128xf32>
    %74 = tpu.matmul %73, %72, %cst_26 {dimension_numbers = #tpu.dot_dimension_numbers<[1], [0], [0], [1], [0, 0, 1, 1], [], []>} : vector<512x36xf32>, vector<36x128xf32>, vector<512x128xf32> -> vector<512x128xf32>
    %c0_27 = arith.constant 0 : index
    %c0_28 = arith.constant 0 : index
    %75 = vector.load %arg6[%c0_27, %c0_28] : memref<512x1xf32, #tpu.memory_space<vmem>>, vector<512x1xf32>
    %76 = vector.broadcast %75 : vector<512x1xf32> to vector<512x128xf32>
    %77 = arith.addf %74, %76 : vector<512x128xf32>
    %cst_29 = arith.constant 0.000000e+00 : f32
    %78 = vector.broadcast %cst_29 : f32 to vector<512x128xf32>
    %79 = arith.maximumf %77, %78 : vector<512x128xf32>
    %c0_30 = arith.constant 0 : index
    %c0_31 = arith.constant 0 : index
    %80 = vector.load %arg7[%c0_30, %c0_31] : memref<18x512xf32, #tpu.memory_space<vmem>>, vector<18x512xf32>
    %cst_32 = arith.constant dense<0.000000e+00> : vector<18x128xf32>
    %81 = tpu.matmul %80, %79, %cst_32 {dimension_numbers = #tpu.dot_dimension_numbers<[1], [0], [0], [1], [0, 0, 1, 1], [], []>} : vector<18x512xf32>, vector<512x128xf32>, vector<18x128xf32> -> vector<18x128xf32>
    %c0_33 = arith.constant 0 : index
    %c0_34 = arith.constant 0 : index
    %82 = vector.load %arg8[%c0_33, %c0_34] : memref<18x1xf32, #tpu.memory_space<vmem>>, vector<18x1xf32>
    %83 = vector.broadcast %82 : vector<18x1xf32> to vector<18x128xf32>
    %84 = arith.addf %81, %83 : vector<18x128xf32>
    %c0_35 = arith.constant 0 : index
    %c0_36 = arith.constant 0 : index
    %c0_37 = arith.constant 0 : index
    %85 = vector.load %arg9[%c0_35, %c0_36, %c0_37] : memref<1x18x128xf32, #tpu.memory_space<vmem>>, vector<1x18x128xf32>
    %86 = vector.shape_cast %85 : vector<1x18x128xf32> to vector<18x128xf32>
    %87 = vector.shape_cast %84 : vector<18x128xf32> to vector<1x18x128xf32>
    tpu.vector_store %arg9[%c0_35, %c0_36, %c0_37], %87 {strides = array<i32>} : memref<1x18x128xf32, #tpu.memory_space<vmem>>, vector<1x18x128xf32>,
    return
  }
  func.func @transform_0(%arg0: i32, %arg1: i32) -> (i32, i32, i32) {
    %c0_i32 = arith.constant 0 : i32
    %c0_i32_0 = arith.constant 0 : i32
    return %arg0, %c0_i32, %arg1 : i32, i32, i32
  }
  func.func @transform_1(%arg0: i32, %arg1: i32) -> (i32, i32, i32, i32) {
    %c1_i32 = arith.constant 1 : i32
    %0 = arith.muli %arg1, %c1_i32 : i32
    %c1_i32_0 = arith.constant 1 : i32
    %1 = arith.subi %0, %c1_i32_0 : i32
    %c0_i32 = arith.constant 0 : i32
    %2 = arith.maxsi %1, %c0_i32 : i32
    %c0_i32_1 = arith.constant 0 : i32
    %c0_i32_2 = arith.constant 0 : i32
    %c0_i32_3 = arith.constant 0 : i32
    return %arg0, %c0_i32_1, %2, %c0_i32_2 : i32, i32, i32, i32
  }
  func.func @transform_2(%arg0: i32, %arg1: i32) -> (i32, i32, i32, i32) {
    %c1_i32 = arith.constant 1 : i32
    %0 = arith.addi %arg1, %c1_i32 : i32
    %c1_i32_0 = arith.constant 1 : i32
    %1 = arith.muli %0, %c1_i32_0 : i32
    %c1_i32_1 = arith.constant 1 : i32
    %2 = arith.minsi %1, %c1_i32_1 : i32
    %c0_i32 = arith.constant 0 : i32
    %c0_i32_2 = arith.constant 0 : i32
    %c0_i32_3 = arith.constant 0 : i32
    return %arg0, %c0_i32, %2, %c0_i32_2 : i32, i32, i32, i32
  }
  func.func @transform_3(%arg0: i32, %arg1: i32) -> (i32, i32) {
    %c0_i32 = arith.constant 0 : i32
    %c0_i32_0 = arith.constant 0 : i32
    %c0_i32_1 = arith.constant 0 : i32
    return %c0_i32, %c0_i32_0 : i32, i32
  }
  func.func @transform_4(%arg0: i32, %arg1: i32) -> (i32, i32) {
    %c0_i32 = arith.constant 0 : i32
    %c0_i32_0 = arith.constant 0 : i32
    %c0_i32_1 = arith.constant 0 : i32
    return %c0_i32, %c0_i32_0 : i32, i32
  }
  func.func @transform_5(%arg0: i32, %arg1: i32) -> (i32, i32) {
    %c0_i32 = arith.constant 0 : i32
    %c0_i32_0 = arith.constant 0 : i32
    %c0_i32_1 = arith.constant 0 : i32
    return %c0_i32, %c0_i32_0 : i32, i32
  }
  func.func @transform_6(%arg0: i32, %arg1: i32) -> (i32, i32) {
    %c0_i32 = arith.constant 0 : i32
    %c0_i32_0 = arith.constant 0 : i32
    %c0_i32_1 = arith.constant 0 : i32
    return %c0_i32, %c0_i32_0 : i32, i32
  }
  func.func @transform_7(%arg0: i32, %arg1: i32) -> (i32, i32, i32) {
    %c0_i32 = arith.constant 0 : i32
    %c0_i32_0 = arith.constant 0 : i32
    return %arg0, %c0_i32, %arg1 : i32, i32, i32
  }
}

</mosaic_0001>

<bundles_post_ra>
// kernel: tpu_custom_call.1
= control target key start
LH: loop header
LB: loop body
LE: loop exit
PB: predicated region body
PF: predicated region fallthrough
CT: control target
= control target key end

     0   :  { %s3214_s0 = inlined_call_operand.vmem [shape: f32[2,4,256], index: 0, kind: input, shape index: {}]   ;;  %s3215_s1 = inlined_call_operand.vmem [shape: f32[2,4,16,16], index: 1, kind: input, shape index: {}]   ;;  %s3216_s2 = inlined_call_operand.vmem [shape: f32[2,4,16,16], index: 2, kind: input, shape index: {}]   ;;  %s3217_s3 = inlined_call_operand.vmem [shape: f32[512,36], index: 3, kind: input, shape index: {}]   ;;  %s3218_s4 = inlined_call_operand.vmem [shape: f32[512,1], index: 4, kind: input, shape index: {}]   ;;  %s3219_s5 = inlined_call_operand.vmem [shape: f32[18,512], index: 5, kind: input, shape index: {}]   ;;  %s3220_s6 = inlined_call_operand.vmem [shape: f32[18,1], index: 6, kind: input, shape index: {}]   ;;  %s3221_s7 = inlined_call_operand.vmem [shape: f32[2,18,256], index: 7, kind: output, shape index: {}]  }
   0x1   :  { %3225 = sst [smem:[#allocation32_spill]] %s3215_s1 }
   0x2   :  { %3226 = sst [smem:[#allocation33_spill]] %s3219_s5 }
   0x3   :  { %3227 = sst [smem:[#allocation34_spill]] %s3221_s7 }
   0x4   :  { %s2250_s24 = smov 0   ;;  %s2252_s25 = smov 0  }
   0x5   :  { %s2254_s26 = smov 0   ;;  %s2256_s27 = smov 0  }
   0x6   :  { %s2258_s28 = smov 0   ;;  %s2260_s29 = smov 0  }
   0x7   :  { %s2262_s30 = smov 0   ;;  %s2264_s8 = smov 0  }
   0x8   :  { %s2266_s9 = smov 0   ;;  %s2268_s10 = smov 0  }
   0x9   :  { %s2270_s11 = smov 0  }
   0xa LB: > { %s1843_s12 = sadd.s32 4294967295, %s2197_s11   ;;  %s26_s13 = sadd.s32 1, %s2189_s9  ;;  %s2197_s11 = sphi %s2270_s11, %s17_s11   ;;  %s2193_s10 = sphi %s2268_s10, %s3301_s10   ;;  %s2189_s9 = sphi %s2266_s9, %s3300_s9   ;;  %s2185_s8 = sphi %s2264_s8, %s3299_s8   ;;  %s2181_s30 = sphi %s2262_s30, %s3298_s30   ;;  %s2177_s29 = sphi %s2260_s29, %s3297_s29   ;;  %s2173_s28 = sphi %s2258_s28, %s3296_s28   ;;  %s2169_s27 = sphi %s2256_s27, %s3295_s27   ;;  %s2165_s26 = sphi %s2254_s26, %s3294_s26   ;;  %s2161_s25 = sphi %s2252_s25, %s3293_s25   ;;  %s2157_s24 = sphi %s2250_s24, %s3292_s24  }
   0xb   : > { %p27_p0 = scmp.ge.s32.totalorder %s26_s13, 2  ;;  %s29_s14 = sadd.s32 1, %s2193_s10 }
   0xc   : > { %s72_s15 = sadd.s32 1, %s2177_s29  ;;  %p79_p2 = scmp.ne.s32.totalorder %s2177_s29, %s2173_s28 }
   0xd   : > { %s3303_s13 = smov (%p27_p0, %s26_s13), 0  ;;  %s3305_s14 = smov (!%p27_p0, %s29_s14), %s2193_s10 }
   0xe   : > { %3228 = sst [smem:[#allocation5_spill]] %s3303_s13  ;;  %p31_p1 = scmp.ge.s32.totalorder %s3305_s14, 2 }
   0xf   : > { %p80_p3 = scmp.eq.s32.totalorder %s2197_s11, 0  ;;  %s106_s19 = sadd.s32 1, %s2169_s27 }
  0x10   : > { %s3307_s14 = smov (%p31_p1, %s3305_s14), 0  ;;  %p113_p6 = scmp.ne.s32.totalorder %s2169_s27, %s2165_s26 }
  0x11   : > { %3229 = sst [smem:[#allocation6_spill]] %s3307_s14  ;;  %s67_s16 = ssub.s32 %s2193_s10, %s3307_s14 }
  0x12   : > { %p70_p4 = scmp.eq.s32.totalorder %s67_s16, 0  ;;  %p2319_p5 = por %p80_p3, %p79_p2 }
  0x13   : > { %s214_s20 = ssub.s32 %s2189_s9, %s3303_s13  ;;  %s218_s21 = sadd.s32 1, %s2161_s25 }
  0x14   : > { %s2324_s18 = scalar_select %p70_p4, %s2177_s29, %s72_s15  }
  0x15   : > { %p2332_p7 = por %p113_p6, %p80_p3  ;;  %s215_s23 = sor.u32 %s214_s20, %s67_s16 }
  0x16   : > { %p216_p8 = scmp.eq.s32.totalorder %s215_s23, 0  ;;  %p228_p9 = scmp.ne.s32.totalorder %s2161_s25, %s2157_s24 }
  0x17   : > { %p229_p10 = scmp.eq.s32.totalorder %s1843_s12, 3  ;;  %p1848_p12 = scmp.ge.s32.totalorder %s2197_s11, 4 }
  0x18   : > { %s2339_s14 = scalar_select %p216_p8, %s2161_s25, %s218_s21  }
  0x19   : > { %s2342_s7 = scalar_select %p70_p4, %s2169_s27, %s106_s19  }
  0x1a   : > { %p2344_p11 = por %p229_p10, %p228_p9  ;;  %263 = sbr.rel (%p1848_p12) target bundleno = 54 (0x36), region = 32 }
  0x1f   : > { %277 = sbr.rel (!%p2319_p5) target bundleno = 45 (0x2d), region = 40  ;;  %s279_s15 = sand.u32 (%p2319_p5), 1, %s2177_s29  }
  0x20   : > { %s1849_s16 = sshll.u32 (%p2319_p5), %s279_s15, 5  ;;  %s2151_s20 = sshll.u32 (%p2319_p5), %s2193_s10, 6 }
  0x21   : > { %s3233_s1 = sld [smem:[#allocation32_spill]] (%p2319_p5)  ;;  %s281_s23 = scalar_lea.vmem (%p2319_p5), [#allocation2], %s1849_s16 }
  0x27   : > { %s288_s19 = scalar_lea.vmem %s3233_s1, %s2151_s20 }
  0x28   : > { %v323_v0 = vld [vmem:[%s288_s19] sm:$0xff]  ;;  %v325_v1 = vld [vmem:[%s288_s19 + $0x10] sm:$0xff] }
  0x29   : > { %v327_v2 = vld [vmem:[%s288_s19 + $0x20] sm:$0xff]  ;;  %324 = vst [vmem:[%s281_s23] sm:$0xff] %v323_v0  ;;  %v329_v3 = vld [vmem:[%s288_s19 + $0x30] sm:$0xff] }
  0x2a   : > { %326 = vst [vmem:[%s281_s23 + $0x8] sm:$0xff] %v325_v1 }
  0x2b   : > { %328 = vst [vmem:[%s281_s23 + $0x10] sm:$0xff] %v327_v2 }
  0x2c   : > { %330 = vst [vmem:[%s281_s23 + $0x18] sm:$0xff] %v329_v3 }
  0x2d PF: > { %336 = sbr.rel (!%p2332_p7) target bundleno = 54 (0x36), region = 78  ;;  %s338_s17 = sand.u32 (%p2332_p7), 1, %s2169_s27  }
  0x2e   : > { %s1853_s15 = sshll.u32 (%p2332_p7), %s338_s17, 5  ;;  %s2154_s13 = sshll.u32 (%p2332_p7), %s2193_s10, 6 }
  0x2f   : > { %s2153_s12 = sadd.s32 (%p2332_p7), 8, %s2154_s13  ;;  %s340_s16 = scalar_lea.vmem (%p2332_p7), [#allocation3], %s1853_s15 }
  0x30   : > { %s347_s1 = scalar_lea.vmem (%p2332_p7), %s3216_s2, %s2153_s12 }
  0x31   : > { %v382_v4 = vld [vmem:[%s347_s1] sm:$0xff] (%p2332_p7)  ;;  %v384_v5 = vld [vmem:[%s347_s1 + $0x10] sm:$0xff] (%p2332_p7) }
  0x32   : > { %v386_v6 = vld [vmem:[%s347_s1 + $0x20] sm:$0xff]  ;;  %383 = vst [vmem:[%s340_s16] sm:$0xff] %v382_v4  ;;  %v388_v7 = vld [vmem:[%s347_s1 + $0x30] sm:$0xff] }
  0x33   : > { %385 = vst [vmem:[%s340_s16 + $0x8] sm:$0xff] %v384_v5 }
  0x34   : > { %387 = vst [vmem:[%s340_s16 + $0x10] sm:$0xff] %v386_v6 }
  0x35   : > { %389 = vst [vmem:[%s340_s16 + $0x18] sm:$0xff] %v388_v7 }
  0x36 PF: > { %p1856_p13 = scmp.ge.s32.totalorder %s2197_s11, 1  ;;  %p394_p0 = scmp.lt.s32.totalorder %s2197_s11, 5 }
  0x38   : > { %p395_p1 = pnand %p1856_p13, %p394_p0 }
  0x3a   : > { %398 = sbr.rel (%p395_p1) target bundleno = 804 (0x324), region = 116 }
  0x3f   : > { %s401_s13 = sand.u32 1, %s2173_s28   ;;  %p465_p2 = scmp.gt.s32.totalorder %s2181_s30, 0  ;;  %vm495_vm0 = vcmask 1041409   ;;  %vm498_vm1 = vcmask 1042434   ;;  %vm501_vm2 = vcmask 1043459   ;;  %v2201_v30 = vmov 0  }
  0x40   : > { %s1857_s22 = sshll.u32 %s401_s13, 5  ;;  %s408_s19 = sand.u32 1, %s2165_s26   ;;  %2081 = vset.pattern.permute.xlu1 %v2201_v30  ;;  %2080 = vset.pattern.permute.xlu0 %v2201_v30  ;;  %vm523_vm3 = vcmask 7168   ;;  %vm525_vm4 = vcmask 138240   ;;  %vm528_vm5 = vcmask 269312   ;;  %v691_v42 = vld [vmem:[%s3218_s4] sm:$0xff] }
  0x41   : > { %s1858_s1 = sshll.u32 %s408_s19, 5  ;;  %p452_p3 = scmp.lt.s32.totalorder %s2181_s30, 1  ;;  %2082 = vset.pattern.permute.xlu2 %v2201_v30  ;;  %v692_v43 = vld [vmem:[%s3218_s4 + $0x8] sm:$0xff]  ;;  %v694_v45 = vld [vmem:[%s3218_s4 + $0x18] sm:$0xff]  ;;  %v693_v46 = vld [vmem:[%s3218_s4 + $0x10] sm:$0xff]  ;;  %vm589_vm6 = vcmask 769024  }
  0x42   : > { %s2084_s23 = scalar_select %p465_p2, 255, 0  ;;  %v696_v44 = vld [vmem:[%s3218_s4 + $0x28] sm:$0xff]  ;;  %v699_v47 = vld [vmem:[%s3218_s4 + $0x40] sm:$0xff]  ;;  %v697_v48 = vld [vmem:[%s3218_s4 + $0x30] sm:$0xff]  ;;  %vm622_vm7 = vcmask 1043456  }
  0x43   : > { %s403_s17 = scalar_lea.vmem [#allocation2], %s1857_s22  ;;  %p450_p4 = scmp.lt.s32.totalorder %s2185_s8, 1  ;;  %v695_v49 = vld [vmem:[%s3218_s4 + $0x20] sm:$0xff]  ;;  %v702_v50 = vld [vmem:[%s3218_s4 + $0x58] sm:$0xff]  ;;  %v700_v51 = vld [vmem:[%s3218_s4 + $0x48] sm:$0xff]  ;;  %vm573_vm9 = vcmask 900096  }
  0x44   : > { %v2085_v8 = vld [vmem:[%s403_s17] sm:%s2084_s23]  ;;  %v2088_v9 = vld [vmem:[%s403_s17 + $0x8] sm:%s2084_s23]  ;;  %s2199_s26 = smov 1   ;;  %s410_s15 = scalar_lea.vmem [#allocation3], %s1858_s1  ;;  %vm581_vm10 = vcmask 785408   ;;  %vm619_vm11 = vcmask 777216  }
  0x45   : > { %v493_v10 = vrot.slane %v2085_v8, 7  ;;  %v2091_v11 = vld [vmem:[%s403_s17 + $0x10] sm:%s2084_s23]  ;;  %v494_v12 = vrot.slane %v2088_v9, 6  ;;  %v2094_v13 = vld [vmem:[%s403_s17 + $0x18] sm:%s2084_s23]  ;;  %s2096_s28 = scalar_select %p452_p3, 255, 0 }
  0x46   : > { %v497_v14 = vrot.slane %v2091_v11, 5  ;;  %v500_v16 = vrot.slane %v2094_v13, 4  ;;  %s451_s12 = scalar_select %p450_p4, %s2185_s8, 1  ;;  %v698_v52 = vld [vmem:[%s3218_s4 + $0x38] sm:$0xff]  ;;  %v705_v53 = vld [vmem:[%s3218_s4 + $0x70] sm:$0xff]  ;;  %v703_v54 = vld [vmem:[%s3218_s4 + $0x60] sm:$0xff] }
  0x47   : > { %v496_v15 = vsel %vm495_vm0, %v494_v12, %v493_v10  ;;  %v2097_v19 = vld [vmem:[%s410_s15] sm:%s2096_s28]  ;;  %v2100_v20 = vld [vmem:[%s410_s15 + $0x8] sm:%s2096_s28]  ;;  %s453_s20 = scalar_select %p452_p3, %s2181_s30, 1  ;;  %v530_v12 = vlaneseq  ;;  %vm565_vm12 = vcmask 916480   ;;  %vm609_vm14 = vcmask 908288  }
  0x48   : > { %v499_v17 = vsel %vm498_vm1, %v497_v14, %v496_v15  ;;  %v2103_v21 = vld [vmem:[%s410_s15 + $0x10] sm:%s2096_s28]  ;;  %v514_v22 = vrot.slane %v2100_v20, 7  ;;  %v2106_v23 = vld [vmem:[%s410_s15 + $0x18] sm:%s2096_s28]  ;;  %s1859_s21 = sshll.u32 %s451_s12, 1  ;;  %s2200_s22 = smov 17   ;;  %vm557_vm15 = vcmask 1031168  }
  0x49   : > { %v502_v18 = vsel %vm501_vm2, %v500_v16, %v499_v17  ;;  %v516_v24 = vrot.slane %v2103_v21, 6  ;;  %v518_v26 = vrot.slane %v2106_v23, 5  ;;  %s455_s16 = sadd.s32 %s1859_s21, %s453_s20  ;;  %s2202_s17 = smov 94   ;;  %v701_v55 = vld [vmem:[%s3218_s4 + $0x50] sm:$0xff]  ;;  %v708_v56 = vld [vmem:[%s3218_s4 + $0x88] sm:$0xff]  ;;  %v706_v57 = vld [vmem:[%s3218_s4 + $0x78] sm:$0xff] }
  0x4a   : > { %503 = vrot.lane.b32.xlu0 %v502_v18, %s2199_s26  ;;  %v515_v25 = vsel %vm495_vm0, %v514_v22, %v2097_v19  ;;  %s1860_s13 = sshll.u32 %s455_s16, 2  ;;  %s2203_s26 = smov 96   ;;  %v704_v58 = vld [vmem:[%s3218_s4 + $0x68] sm:$0xff]  ;;  %v711_v59 = vld [vmem:[%s3218_s4 + $0xa0] sm:$0xff]  ;;  %v709_v60 = vld [vmem:[%s3218_s4 + $0x90] sm:$0xff]  ;;  %v531_v15 = vand.u32 127, %v530_v12 }
  0x4b   : > { %v517_v27 = vsel %vm498_vm1, %v516_v24, %v515_v25  ;;  %s457_s23 = scalar_lea.vmem %s3214_s0, %s1860_s13  ;;  %s2204_s28 = smov 95   ;;  %v707_v61 = vld [vmem:[%s3218_s4 + $0x80] sm:$0xff]  ;;  %v714_v62 = vld [vmem:[%s3218_s4 + $0xb8] sm:$0xff]  ;;  %v712_v63 = vld [vmem:[%s3218_s4 + $0xa8] sm:$0xff]  ;;  %vm599_vm0 = vcmask 1039360   ;;  %vm1075_vm1 = vcmask 293888  }
  0x4c   : > { %v519_v28 = vsel %vm501_vm2, %v518_v26, %v517_v27  ;;  %v464_v29 = vld [vmem:[%s457_s23] sm:$0xf]  ;;  %s2205_s15 = smov 110   ;;  %s2206_s12 = smov 111   ;;  %v710_v0 = vld [vmem:[%s3218_s4 + $0x98] sm:$0xff]  ;;  %v717_v1 = vld [vmem:[%s3218_s4 + $0xd0] sm:$0xff] }
  0x4d   : > { %520 = vrot.lane.b32.xlu1 %v519_v28, %s2200_s22  ;;  %s2207_s20 = smov 126   ;;  %s2208_s13 = smov 112   ;;  %v715_v2 = vld [vmem:[%s3218_s4 + $0xc0] sm:$0xff]  ;;  %v713_v3 = vld [vmem:[%s3218_s4 + $0xb0] sm:$0xff]  ;;  %v722_v4 = vld [vmem:[%s3218_s4 + $0xf8] sm:$0xff]  ;;  %v536_v18 = vand.u32 15, %v531_v15 }
  0x4e   : > { %v718_v5 = vld [vmem:[%s3218_s4 + $0xd8] sm:$0xff]  ;;  %v716_v6 = vld [vmem:[%s3218_s4 + $0xc8] sm:$0xff]  ;;  %v721_v9 = vld [vmem:[%s3218_s4 + $0xf0] sm:$0xff]  ;;  %s3263_s23 = sld [smem:[#allocation33_spill]]  ;;  %s447_s19 = sand.u32 1, %s2157_s24  }
  0x4f   : > { %v720_v7 = vld [vmem:[%s3218_s4 + $0xe8] sm:$0xff]  ;;  %v719_v10 = vld [vmem:[%s3218_s4 + $0xe0] sm:$0xff]  ;;  %v737_v14 = vld [vmem:[%s3218_s4 + $0x170] sm:$0xff]  ;;  %vm2498_vm8 = vcmp.ne.s32.totalorder %v536_v18, 15  ;;  %vm2519_vm13 = vcmp.ne.s32.totalorder %v536_v18, 0  ;;  %s1944_s1 = smul.u32 24, %s447_s19 }
  0x50   : > { %v735_v11 = vld [vmem:[%s3218_s4 + $0x160] sm:$0xff]  ;;  %v738_v16 = vld [vmem:[%s3218_s4 + $0x178] sm:$0xff]  ;;  %v733_v17 = vld [vmem:[%s3218_s4 + $0x150] sm:$0xff]  ;;  %s1945_s24 = smul.u32 (%p2344_p11), 6, %s2185_s8 }
  0x51   : > { %v734_v27 = vld [vmem:[%s3218_s4 + $0x158] sm:$0xff]  ;;  %v736_v30 = vld [vmem:[%s3218_s4 + $0x168] sm:$0xff]  ;;  %v675_v15 = vld [vmem:[%s3217_s3 + $0x180] sm:$0xff] }
  0x52   : > { %507 = vrot.lane.b32.xlu0 %v464_v29, %s2200_s22  ;;  %v628_v12 = vld [vmem:[%s3217_s3 + $0x8] sm:$0xff]  ;;  %v650_v20 = vld [vmem:[%s3217_s3 + $0xb8] sm:$0xff] }
  0x53   : > { %v728_v18 = vld [vmem:[%s3218_s4 + $0x128] sm:$0xff] }
  0xbc   : > { %v504_v31 = vpop.permute.xlu0 %503 }
  0xbd   : > { %v524_v33 = vsel %vm523_vm3, 0.0, %v504_v31  ;;  %v752_v31 = vld [vmem:[%s3218_s4 + $0x1e8] sm:$0xff] }
  0xbf   : > { %v521_v32 = vpop.permute.xlu1 %520 }
  0xc4   : > { %v508_v34 = vpop.permute.xlu0 %507 }
  0xc5   : > { %v2385_v35 = vsel %vm525_vm4, %v524_v33, %v508_v34  ;;  %v527_v36 = vsel %vm525_vm4, %v508_v34, %v521_v32 }
  0xc6   : > { %v529_v37 = vsel %vm528_vm5, %v527_v36, 0.0  ;;  %585 = vrot.lane.b32.xlu1 %v2385_v35, %s2202_s17  ;;  %v593_v39 = vrot.slane %v2385_v35, 4 }
  0xc7   : > { %587 = vrot.lane.b32.xlu2 %v529_v37, %s2202_s17  ;;  %v2050_v38 = vpack.i.bf16 %v529_v37, %v2385_v35  ;;  %v594_v40 = vrot.slane %v529_v37, 4  ;;  %s2209_s17 = smov 127  }
  0xc9   : > { %2051 = vrot.lane.b32.xlu0 %v2050_v38, %s2203_s26  ;;  %v2065_v41 = vpack.i.bf16 %v594_v40, %v593_v39  ;;  %s1689_s26 = sadd.s32 (%p2344_p11), %s2181_s30, %s1945_s24 }
  0xce   : > { %2066 = vrot.lane.b32.xlu1 %v2065_v41, %s2204_s28  ;;  %s1926_s28 = sshll.u32 (%p2344_p11), %s1689_s26, 3 }
  0xcf   : > { %2046 = vrot.lane.b32.xlu2 %v2050_v38, %s2205_s15 }
  0xd1   : > { %2061 = vrot.lane.b32.xlu0 %v2050_v38, %s2206_s12 }
  0xd6   : > { %2071 = vrot.lane.b32.xlu1 %v2050_v38, %s2207_s20  ;;  %s3289_s20 = sld [smem:[#allocation34_spill]] (%p2344_p11) }
  0xd7   : > { %2056 = vrot.lane.b32.xlu2 %v2050_v38, %s2208_s13 }
  0xd9   : > { %757 = vperm.xlu0 %2080, %v691_v42  }
  0xdc   : > { %s1691_s21 = scalar_lea.vmem (%p2344_p11), %s3289_s20, %s1926_s28 }
  0xde   : > { %762 = vperm.xlu1 %2081, %v692_v43  }
  0xdf   : > { %2076 = vrot.lane.b32.xlu2 %v2065_v41, %s2209_s17  ;;  %v744_v41 = vld [vmem:[%s3218_s4 + $0x1a8] sm:$0xff]  ;;  %s449_s17 = scalar_lea.vmem [#allocation4], %s1944_s1 }
  0xe1   : > { %782 = vperm.xlu0 %2080, %v696_v44  }
  0xe6   : > { %772 = vperm.xlu1 %2081, %v694_v45  }
  0xe7   : > { %767 = vperm.xlu2 %2082, %v693_v46  }
  0xe9   : > { %797 = vperm.xlu0 %2080, %v699_v47  }
  0xee   : > { %787 = vperm.xlu1 %2081, %v697_v48   ;;  %v753_v48 = vld [vmem:[%s3218_s4 + $0x1f0] sm:$0xff] }
  0xef   : > { %777 = vperm.xlu2 %2082, %v695_v49   ;;  %v754_v49 = vld [vmem:[%s3218_s4 + $0x1f8] sm:$0xff] }
  0xf1   : > { %812 = vperm.xlu0 %2080, %v702_v50  }
  0xf6   : > { %802 = vperm.xlu1 %2081, %v700_v51  }
  0xf7   : > { %792 = vperm.xlu2 %2082, %v698_v52  }
  0xf9   : > { %827 = vperm.xlu0 %2080, %v705_v53  }
  0xfe   : > { %817 = vperm.xlu1 %2081, %v703_v54  }
  0xff   : > { %807 = vperm.xlu2 %2082, %v701_v55   ;;  %v730_v55 = vld [vmem:[%s3218_s4 + $0x138] sm:$0xff] }
 0x101   : > { %842 = vperm.xlu0 %2080, %v708_v56  }
 0x106   : > { %832 = vperm.xlu1 %2081, %v706_v57  }
 0x107   : > { %822 = vperm.xlu2 %2082, %v704_v58  }
 0x109   : > { %857 = vperm.xlu0 %2080, %v711_v59  }
 0x10e   : > { %847 = vperm.xlu1 %2081, %v709_v60  }
 0x10f   : > { %837 = vperm.xlu2 %2082, %v707_v61  }
 0x111   : > { %872 = vperm.xlu0 %2080, %v714_v62  }
 0x116   : > { %862 = vperm.xlu1 %2081, %v712_v63  }
 0x117   : > { %852 = vperm.xlu2 %2082, %v710_v0   ;;  %v731_v0 = vld [vmem:[%s3218_s4 + $0x140] sm:$0xff] }
 0x119   : > { %887 = vperm.xlu0 %2080, %v717_v1  }
 0x11e   : > { %877 = vperm.xlu1 %2081, %v715_v2  }
 0x11f   : > { %867 = vperm.xlu2 %2082, %v713_v3  }
 0x121   : > { %912 = vperm.xlu0 %2080, %v722_v4   ;;  %v588_v8 = vpop.permute.xlu2 %587  ;;  %v548_v4 = vsel %vm2519_vm13, %v2385_v35, 0.0  ;;  %v674_v35 = vld [vmem:[%s3217_s3 + $0x178] sm:$0xff] }
 0x126   : > { %892 = vperm.xlu1 %2081, %v718_v5  }
 0x127   : > { %882 = vperm.xlu2 %2082, %v716_v6   ;;  %v627_v6 = vld [vmem:[%s3217_s3] sm:$0xff] }
 0x129   : > { %902 = vperm.xlu0 %2080, %v720_v7   ;;  %v2047_v13 = vpop.permute.xlu2 %2046  ;;  %v648_v7 = vld [vmem:[%s3217_s3 + $0xa8] sm:$0xff] }
 0x12a   : > { %v2049_v23 = vunpack.i.h.bf16 %v2047_v13  ;;  %v2048_v24 = vunpack.i.l.bf16 %v2047_v13  ;;  %v649_v13 = vld [vmem:[%s3217_s3 + $0xb0] sm:$0xff] }
 0x12c   : > { %v574_v32 = vsel %vm573_vm9, %v2048_v24, %v2049_v23  ;;  %v729_v23 = vld [vmem:[%s3218_s4 + $0x130] sm:$0xff]  ;;  %v746_v24 = vld [vmem:[%s3218_s4 + $0x1b8] sm:$0xff] }
 0x12d   : > { %v576_v40 = vsel %vm2498_vm8, %v574_v32, 0.0  ;;  %v725_v32 = vld [vmem:[%s3218_s4 + $0x110] sm:$0xff] }
 0x12e   : > { %907 = vperm.xlu1 %2081, %v721_v9   ;;  %v613_v51 = vrot.slane %v576_v40, 4  ;;  %v732_v9 = vld [vmem:[%s3218_s4 + $0x148] sm:$0xff]  ;;  %v743_v40 = vld [vmem:[%s3218_s4 + $0x1a0] sm:$0xff] }
 0x12f   : > { %897 = vperm.xlu2 %2082, %v719_v10   ;;  %v749_v10 = vld [vmem:[%s3218_s4 + $0x1d0] sm:$0xff] }
 0x131   : > { %977 = vperm.xlu0 %2080, %v735_v11   ;;  %v2057_v25 = vpop.permute.xlu2 %2056  ;;  %v750_v11 = vld [vmem:[%s3218_s4 + $0x1d8] sm:$0xff] }
 0x132   : > { %v2059_v36 = vunpack.i.h.bf16 %v2057_v25  ;;  %v2058_v37 = vunpack.i.l.bf16 %v2057_v25  ;;  %v747_v25 = vld [vmem:[%s3218_s4 + $0x1c0] sm:$0xff] }
 0x134   : > { %v566_v50 = vsel %vm565_vm12, %v2058_v37, %v2059_v36  ;;  %v661_v36 = vld [vmem:[%s3217_s3 + $0x110] sm:$0xff]  ;;  %v678_v37 = vld [vmem:[%s3217_s3 + $0x198] sm:$0xff] }
 0x135   : > { %v568_v59 = vsel %vm2519_vm13, %v566_v50, 0.0  ;;  %v742_v50 = vld [vmem:[%s3218_s4 + $0x198] sm:$0xff] }
 0x136   : > { %987 = vperm.xlu1 %2081, %v737_v14   ;;  %v603_v63 = vrot.slane %v568_v59, 4  ;;  %v658_v14 = vld [vmem:[%s3217_s3 + $0xf8] sm:$0xff]  ;;  %v739_v59 = vld [vmem:[%s3218_s4 + $0x180] sm:$0xff] }
 0x137   : > { %992 = vperm.xlu2 %2082, %v738_v16   ;;  %v751_v16 = vld [vmem:[%s3218_s4 + $0x1e0] sm:$0xff] }
 0x138   : > { %v586_v19 = vpop.permute.xlu1 %585 }
 0x139   : > { %v590_v21 = vsel %vm589_vm6, %v586_v19, %v588_v8  ;;  %967 = vperm.xlu0 %2080, %v733_v17   ;;  %v2077_v52 = vpop.permute.xlu2 %2076  ;;  %v657_v8 = vld [vmem:[%s3217_s3 + $0xf0] sm:$0xff]  ;;  %v727_v17 = vld [vmem:[%s3218_s4 + $0x120] sm:$0xff] }
 0x13a   : > { %v592_v22 = vsel %vm2498_vm8, %v590_v21, 0.0  ;;  %v2079_v56 = vunpack.i.h.bf16 %v2077_v52  ;;  %v2078_v57 = vunpack.i.l.bf16 %v2077_v52  ;;  %v629_v19 = vld [vmem:[%s3217_s3 + $0x10] sm:$0xff]  ;;  %v659_v21 = vld [vmem:[%s3217_s3 + $0x100] sm:$0xff]  ;;  %v654_v52 = vld [vmem:[%s3217_s3 + $0xd8] sm:$0xff] }
 0x13b   : > { %v2052_v26 = vpop.permute.xlu0 %2051  ;;  %1861 = vmatpush.msk.msra.mxu0 %vm622_vm7, %v592_v22  ;;  %1929 = vmatpush.msk.msra.mxu1 %vm622_vm7, %v592_v22 }
 0x13c   : > { %v2054_v28 = vunpack.i.h.bf16 %v2052_v26  ;;  %v2053_v29 = vunpack.i.l.bf16 %v2052_v26  ;;  %1930 = vmatpush.msk.msra.mxu2 %vm622_vm7, %v592_v22  ;;  %1931 = vmatpush.msk.msra.mxu3 %vm622_vm7, %v592_v22  ;;  %v600_v2 = vsel %vm599_vm0, %v2078_v57, %v2079_v56  ;;  %v676_v22 = vld [vmem:[%s3217_s3 + $0x188] sm:$0xff]  ;;  %v630_v26 = vld [vmem:[%s3217_s3 + $0x18] sm:$0xff] }
 0x13d   : > { %v623_v5 = vsel %vm622_vm7, %v548_v4, %v600_v2  ;;  %v1557_v56 = vld [vmem:[%s3220_s6 + $0x8] sm:$0xff]  ;;  %v1558_v2 = vld [vmem:[%s3220_s6 + $0x10] sm:$0x3] }
 0x13e   : > { %972 = vperm.xlu1 %2081, %v734_v27   ;;  %v582_v33 = vsel %vm581_vm10, %v2053_v29, %v2054_v28  ;;  %v651_v27 = vld [vmem:[%s3217_s3 + $0xc0] sm:$0xff]  ;;  %v660_v28 = vld [vmem:[%s3217_s3 + $0x108] sm:$0xff]  ;;  %v677_v29 = vld [vmem:[%s3217_s3 + $0x190] sm:$0xff] }
 0x13f   : > { %982 = vperm.xlu2 %2082, %v736_v30   ;;  %v584_v43 = vsel %vm2519_vm13, %v582_v33, 0.0  ;;  %v748_v30 = vld [vmem:[%s3218_s4 + $0x1c8] sm:$0xff]  ;;  %v631_v33 = vld [vmem:[%s3217_s3 + $0x20] sm:$0xff] }
 0x140   : > { %v2067_v34 = vpop.permute.xlu1 %2066 }
 0x141   : > { %v2069_v38 = vunpack.i.h.bf16 %v2067_v34  ;;  %v2068_v39 = vunpack.i.l.bf16 %v2067_v34  ;;  %1062 = vperm.xlu0 %2080, %v752_v31   ;;  %v724_v31 = vld [vmem:[%s3218_s4 + $0x108] sm:$0xff] }
 0x142   : > { %v652_v34 = vld [vmem:[%s3217_s3 + $0xc8] sm:$0xff] }
 0x143   : > { %v2062_v42 = vpop.permute.xlu0 %2061  ;;  %v620_v44 = vsel %vm619_vm11, %v2068_v39, %v2069_v38  ;;  %v726_v38 = vld [vmem:[%s3218_s4 + $0x118] sm:$0xff]  ;;  %v2663_v39 = vpop.permute.xlu2 %767 }
 0x144   : > { %v2064_v45 = vunpack.i.h.bf16 %v2062_v42  ;;  %v2063_v46 = vunpack.i.l.bf16 %v2062_v42  ;;  %v626_v47 = vsel %vm622_vm7, %v584_v43, %v620_v44  ;;  %v632_v42 = vld [vmem:[%s3217_s3 + $0x28] sm:$0xff]  ;;  %v653_v43 = vld [vmem:[%s3217_s3 + $0xd0] sm:$0xff]  ;;  %v662_v44 = vld [vmem:[%s3217_s3 + $0x118] sm:$0xff] }
 0x145   : > { %1283 = vmatpush.msra.mxu0 %v626_v47  ;;  %1932 = vmatpush.msra.mxu1 %v626_v47 }
 0x146   : > { %1933 = vmatpush.msra.mxu2 %v626_v47  ;;  %1934 = vmatpush.msra.mxu3 %v626_v47  ;;  %v610_v53 = vsel %vm609_vm14, %v2063_v46, %v2064_v45  ;;  %v679_v45 = vld [vmem:[%s3217_s3 + $0x1a0] sm:$0xff]  ;;  %v745_v46 = vld [vmem:[%s3218_s4 + $0x1b0] sm:$0xff] }
 0x147   : > { %1067 = vperm.xlu1 %2081, %v753_v48   ;;  %v625_v54 = vsel %vm622_vm7, %v610_v53, %v613_v51  ;;  %1072 = vperm.xlu2 %2082, %v754_v49   ;;  %v740_v48 = vld [vmem:[%s3218_s4 + $0x188] sm:$0xff]  ;;  %v633_v51 = vld [vmem:[%s3217_s3 + $0x30] sm:$0xff]  ;;  %v663_v53 = vld [vmem:[%s3217_s3 + $0x120] sm:$0xff] }
 0x148   : > { %v2072_v58 = vpop.permute.xlu1 %2071  ;;  %1284 = vmatpush.msra.mxu0 %v625_v54  ;;  %1935 = vmatpush.msra.mxu1 %v625_v54 }
 0x149   : > { %v2074_v60 = vunpack.i.h.bf16 %v2072_v58  ;;  %v2073_v61 = vunpack.i.l.bf16 %v2072_v58  ;;  %1936 = vmatpush.msra.mxu2 %v625_v54  ;;  %1937 = vmatpush.msra.mxu3 %v625_v54  ;;  %v680_v54 = vld [vmem:[%s3217_s3 + $0x1a8] sm:$0xff] }
 0x14a   : > { %952 = vperm.xlu0 %2080, %v730_v55   ;;  %v723_v55 = vld [vmem:[%s3218_s4 + $0x100] sm:$0xff] }
 0x14b   : > { %v558_v62 = vsel %vm557_vm15, %v2073_v61, %v2074_v60  ;;  %v2698_v49 = vpop.permute.xlu2 %777  ;;  %v2723_v57 = vpop.permute.xlu0 %757  ;;  %v634_v61 = vld [vmem:[%s3217_s3 + $0x38] sm:$0xff] }
 0x14c   : > { %v560_v1 = vsel %vm2498_vm8, %v558_v62, 0.0  ;;  %v655_v62 = vld [vmem:[%s3217_s3 + $0xe0] sm:$0xff] }
 0x14d   : > { %v624_v3 = vsel %vm622_vm7, %v560_v1, %v603_v63  ;;  %v664_v63 = vld [vmem:[%s3217_s3 + $0x128] sm:$0xff]  ;;  %v741_v1 = vld [vmem:[%s3218_s4 + $0x190] sm:$0xff] }
 0x14e   : > { %1285 = vmatpush.msra.mxu0 %v624_v3  ;;  %1938 = vmatpush.msra.mxu1 %v624_v3 }
 0x14f   : > { %957 = vperm.xlu1 %2081, %v731_v0   ;;  %1939 = vmatpush.msra.mxu2 %v624_v3  ;;  %v681_v0 = vld [vmem:[%s3217_s3 + $0x1b0] sm:$0xff] }
 0x150   : > { %1940 = vmatpush.msra.mxu3 %v624_v3  ;;  %1286 = vmatpush.msra.mxu0 %v623_v5  ;;  %v2690_v47 = vpop.permute.xlu1 %762 }
 0x151   : > { %1941 = vmatpush.msra.mxu1 %v623_v5  ;;  %1942 = vmatpush.msra.mxu2 %v623_v5 }
 0x152   : > { %1943 = vmatpush.msra.mxu3 %v623_v5  ;;  %1862 = vmatmul.msk.f32.vlgmr.msra.gmra.mxu0 %vm1075_vm1, %v627_v6  ;;  %v635_v5 = vld [vmem:[%s3217_s3 + $0x40] sm:$0xff] }
 0x153   : > { %1883 = vmatmul.msk.f32.vlgmr.msra.gmra.mxu1 %vm1075_vm1, %v648_v7  ;;  %1892 = vmatmul.msk.f32.vlgmr.msra.gmra.mxu2 %vm1075_vm1, %v657_v8  ;;  %v2733_v60 = vpop.permute.xlu2 %792  ;;  %v2757_v3 = vpop.permute.xlu0 %782  ;;  %v656_v7 = vld [vmem:[%s3217_s3 + $0xe8] sm:$0xff]  ;;  %v665_v8 = vld [vmem:[%s3217_s3 + $0x130] sm:$0xff] }
 0x154   : > { %1909 = vmatmul.msk.f32.vlgmr.msra.gmra.mxu3 %vm1075_vm1, %v674_v35  ;;  %962 = vperm.xlu2 %2082, %v732_v9   ;;  %v682_v35 = vld [vmem:[%s3217_s3 + $0x1b8] sm:$0xff]  ;;  %v1556_v9 = vld [vmem:[%s3220_s6] sm:$0xff] }
 0x155   : > { %1047 = vperm.xlu0 %2080, %v749_v10  }
 0x157   : > { %1052 = vperm.xlu1 %2081, %v750_v11   ;;  %v636_v11 = vld [vmem:[%s3217_s3 + $0x48] sm:$0xff] }
 0x158   : > { %v2727_v58 = vpop.permute.xlu1 %772 }
 0x15a   : > { %1863 = vmatmul.msk.f32.gmra.mxu0 %vm1075_vm1, %v628_v12 }
 0x15b   : > { %1884 = vmatmul.msk.f32.gmra.mxu1 %vm1075_vm1, %v649_v13  ;;  %1893 = vmatmul.msk.f32.gmra.mxu2 %vm1075_vm1, %v658_v14  ;;  %v2764_v6 = vpop.permute.xlu2 %807  ;;  %v2782_v10 = vpop.permute.xlu0 %797  ;;  %v666_v13 = vld [vmem:[%s3217_s3 + $0x138] sm:$0xff]  ;;  %v683_v14 = vld [vmem:[%s3217_s3 + $0x1c0] sm:$0xff] }
 0x15c   : > { %1910 = vmatmul.msk.f32.gmra.mxu3 %vm1075_vm1, %v675_v15  ;;  %1057 = vperm.xlu2 %2082, %v751_v16   ;;  %v637_v16 = vld [vmem:[%s3217_s3 + $0x50] sm:$0xff] }
 0x15d   : > { %937 = vperm.xlu0 %2080, %v727_v17   ;;  %v667_v17 = vld [vmem:[%s3217_s3 + $0x140] sm:$0xff] }
 0x15f   : > { %942 = vperm.xlu1 %2081, %v728_v18  }
 0x160   : > { %v2759_v4 = vpop.permute.xlu1 %787 }
 0x162   : > { %1864 = vmatmul.msk.f32.gmra.mxu0 %vm1075_vm1, %v629_v19  ;;  %v684_v19 = vld [vmem:[%s3217_s3 + $0x1c8] sm:$0xff] }
 0x163   : > { %1885 = vmatmul.msk.f32.gmra.mxu1 %vm1075_vm1, %v650_v20  ;;  %1894 = vmatmul.msk.f32.gmra.mxu2 %vm1075_vm1, %v659_v21  ;;  %v2795_v15 = vpop.permute.xlu2 %822  ;;  %v2806_v18 = vpop.permute.xlu0 %812 }
 0x164   : > { %1911 = vmatmul.msk.f32.gmra.mxu3 %vm1075_vm1, %v676_v22  ;;  %947 = vperm.xlu2 %2082, %v729_v23   ;;  %v638_v22 = vld [vmem:[%s3217_s3 + $0x58] sm:$0xff]  ;;  %v668_v23 = vld [vmem:[%s3217_s3 + $0x148] sm:$0xff] }
 0x165   : > { %1032 = vperm.xlu0 %2080, %v746_v24   ;;  %v685_v24 = vld [vmem:[%s3217_s3 + $0x1d0] sm:$0xff] }
 0x167   : > { %1037 = vperm.xlu1 %2081, %v747_v25  }
 0x168   : > { %v2787_v12 = vpop.permute.xlu1 %802 }
 0x16a   : > { %1865 = vmatmul.msk.f32.gmra.mxu0 %vm1075_vm1, %v630_v26 }
 0x16b   : > { %1886 = vmatmul.msk.f32.gmra.mxu1 %vm1075_vm1, %v651_v27  ;;  %1895 = vmatmul.msk.f32.gmra.mxu2 %vm1075_vm1, %v660_v28  ;;  %v2815_v21 = vpop.permute.xlu2 %837  ;;  %v2828_v25 = vpop.permute.xlu0 %827  ;;  %v639_v28 = vld [vmem:[%s3217_s3 + $0x60] sm:$0xff] }
 0x16c   : > { %1912 = vmatmul.msk.f32.gmra.mxu3 %vm1075_vm1, %v677_v29  ;;  %1042 = vperm.xlu2 %2082, %v748_v30   ;;  %3238 = vst [vmem:[#allocation7_spill] sm:$0xff] %v2815_v21  ;;  %v669_v29 = vld [vmem:[%s3217_s3 + $0x150] sm:$0xff]  ;;  %v686_v30 = vld [vmem:[%s3217_s3 + $0x1d8] sm:$0xff] }
 0x16d   : > { %922 = vperm.xlu0 %2080, %v724_v31  }
 0x16f   : > { %927 = vperm.xlu1 %2081, %v725_v32  }
 0x170   : > { %v2811_v20 = vpop.permute.xlu1 %817 }
 0x172   : > { %1866 = vmatmul.msk.f32.gmra.mxu0 %vm1075_vm1, %v631_v33  ;;  %v640_v33 = vld [vmem:[%s3217_s3 + $0x68] sm:$0xff] }
 0x173   : > { %1887 = vmatmul.msk.f32.gmra.mxu1 %vm1075_vm1, %v652_v34  ;;  %1896 = vmatmul.msk.f32.gmra.mxu2 %vm1075_vm1, %v661_v36  ;;  %v2834_v27 = vpop.permute.xlu2 %852  ;;  %v2848_v31 = vpop.permute.xlu0 %842  ;;  %v670_v36 = vld [vmem:[%s3217_s3 + $0x158] sm:$0xff] }
 0x174   : > { %1913 = vmatmul.msk.f32.gmra.mxu3 %vm1075_vm1, %v678_v37  ;;  %932 = vperm.xlu2 %2082, %v726_v38   ;;  %3239 = vst [vmem:[#allocation8_spill] sm:$0xff] %v2834_v27  ;;  %v687_v37 = vld [vmem:[%s3217_s3 + $0x1e0] sm:$0xff] }
 0x175   : > { %1017 = vperm.xlu0 %2080, %v743_v40   ;;  %3240 = vst [vmem:[#allocation9_spill] sm:$0xff] %v2848_v31  ;;  %v641_v40 = vld [vmem:[%s3217_s3 + $0x70] sm:$0xff] }
 0x177   : > { %1022 = vperm.xlu1 %2081, %v744_v41  }
 0x178   : > { %v2831_v26 = vpop.permute.xlu1 %832 }
 0x17a   : > { %1867 = vmatmul.msk.f32.gmra.mxu0 %vm1075_vm1, %v632_v42  ;;  %v671_v42 = vld [vmem:[%s3217_s3 + $0x160] sm:$0xff] }
 0x17b   : > { %1888 = vmatmul.msk.f32.gmra.mxu1 %vm1075_vm1, %v653_v43  ;;  %1897 = vmatmul.msk.f32.gmra.mxu2 %vm1075_vm1, %v662_v44  ;;  %v2855_v34 = vpop.permute.xlu2 %867  ;;  %v2866_v38 = vpop.permute.xlu0 %857  ;;  %v688_v43 = vld [vmem:[%s3217_s3 + $0x1e8] sm:$0xff] }
 0x17c   : > { %1914 = vmatmul.msk.f32.gmra.mxu3 %vm1075_vm1, %v679_v45  ;;  %1027 = vperm.xlu2 %2082, %v745_v46   ;;  %3242 = vst [vmem:[#allocation11_spill] sm:$0xff] %v2866_v38  ;;  %v642_v45 = vld [vmem:[%s3217_s3 + $0x78] sm:$0xff]  ;;  %v672_v46 = vld [vmem:[%s3217_s3 + $0x168] sm:$0xff] }
 0x17d   : > { %1002 = vperm.xlu0 %2080, %v740_v48  }
 0x17f   : > { %1012 = vperm.xlu1 %2081, %v742_v50   ;;  %v689_v50 = vld [vmem:[%s3217_s3 + $0x1f0] sm:$0xff] }
 0x180   : > { %v2850_v32 = vpop.permute.xlu1 %847 }
 0x181   : > { %3241 = vst [vmem:[#allocation10_spill] sm:$0xff] %v2850_v32 }
 0x182   : > { %1868 = vmatmul.msk.f32.gmra.mxu0 %vm1075_vm1, %v633_v51 }
 0x183   : > { %1889 = vmatmul.msk.f32.gmra.mxu1 %vm1075_vm1, %v654_v52  ;;  %1898 = vmatmul.msk.f32.gmra.mxu2 %vm1075_vm1, %v663_v53  ;;  %v2879_v44 = vpop.permute.xlu2 %882  ;;  %v2890_v48 = vpop.permute.xlu0 %872 }
 0x184   : > { %1915 = vmatmul.msk.f32.gmra.mxu3 %vm1075_vm1, %v680_v54  ;;  %917 = vperm.xlu2 %2082, %v723_v55   ;;  %v643_v54 = vld [vmem:[%s3217_s3 + $0x80] sm:$0xff] }
 0x185   : > { %1566 = vperm.xlu0 %2080, %v1557_v56   ;;  %v673_v56 = vld [vmem:[%s3217_s3 + $0x170] sm:$0xff] }
 0x187   : > { %997 = vperm.xlu1 %2081, %v739_v59   ;;  %v690_v59 = vld [vmem:[%s3217_s3 + $0x1f8] sm:$0xff] }
 0x188   : > { %v2871_v41 = vpop.permute.xlu1 %862 }
 0x18a   : > { %1869 = vmatmul.msk.f32.gmra.mxu0 %vm1075_vm1, %v634_v61 }
 0x18b   : > { %1890 = vmatmul.msk.f32.gmra.mxu1 %vm1075_vm1, %v655_v62  ;;  %1899 = vmatmul.msk.f32.gmra.mxu2 %vm1075_vm1, %v664_v63  ;;  %v2899_v52 = vpop.permute.xlu2 %897  ;;  %v888_v61 = vpop.permute.xlu0 %887 }
 0x18c   : > { %1916 = vmatmul.msk.f32.gmra.mxu3 %vm1075_vm1, %v681_v0  ;;  %1007 = vperm.xlu2 %2082, %v741_v1  }
 0x18f   : > { %1571 = vperm.xlu1 %2081, %v1558_v2  }
 0x190   : > { %v2895_v51 = vpop.permute.xlu1 %877 }
 0x192   : > { %1870 = vmatmul.msk.f32.gmra.mxu0 %vm1075_vm1, %v635_v5  ;;  %v644_v5 = vld [vmem:[%s3217_s3 + $0x88] sm:$0xff] }
 0x193   : > { %1891 = vmatmul.msk.f32.gmra.mxu1 %vm1075_vm1, %v656_v7  ;;  %1900 = vmatmul.msk.f32.gmra.mxu2 %vm1075_vm1, %v665_v8  ;;  %v993_v63 = vpop.permute.xlu2 %992 }
 0x194   : > { %1917 = vmatmul.msk.f32.gmra.mxu3 %vm1075_vm1, %v682_v35  ;;  %1561 = vperm.xlu2 %2082, %v1556_v9   ;;  %v913_v9 = vpop.permute.xlu0 %912 }
 0x198   : > { %v893_v62 = vpop.permute.xlu1 %892 }
 0x19a   : > { %1871 = vmatmul.msk.f32.gmra.mxu0 %vm1075_vm1, %v636_v11 }
 0x19b   : > { %1901 = vmatmul.msk.f32.gmra.mxu2 %vm1075_vm1, %v666_v13 }
 0x19c   : > { %1918 = vmatmul.msk.f32.gmra.mxu3 %vm1075_vm1, %v683_v14 }
 0x1a0   : > { %v908_v11 = vpop.permute.xlu1 %907 }
 0x1a2   : > { %1872 = vmatmul.msk.f32.gmra.mxu0 %vm1075_vm1, %v637_v16 }
 0x1a3   : > { %1902 = vmatmul.msk.f32.gmra.mxu2 %vm1075_vm1, %v667_v17 }
 0x1a4   : > { %1919 = vmatmul.msk.f32.gmra.mxu3 %vm1075_vm1, %v684_v19 }
 0x1aa   : > { %1873 = vmatmul.msk.f32.gmra.mxu0 %vm1075_vm1, %v638_v22  ;;  %v645_v22 = vld [vmem:[%s3217_s3 + $0x90] sm:$0xff] }
 0x1ab   : > { %1903 = vmatmul.msk.f32.gmra.mxu2 %vm1075_vm1, %v668_v23 }
 0x1ac   : > { %1920 = vmatmul.msk.f32.gmra.mxu3 %vm1075_vm1, %v685_v24 }
 0x1b2   : > { %1874 = vmatmul.msk.f32.gmra.mxu0 %vm1075_vm1, %v639_v28 }
 0x1b3   : > { %1904 = vmatmul.msk.f32.gmra.mxu2 %vm1075_vm1, %v669_v29 }
 0x1b4   : > { %1921 = vmatmul.msk.f32.gmra.mxu3 %vm1075_vm1, %v686_v30 }
 0x1ba   : > { %1875 = vmatmul.msk.f32.gmra.mxu0 %vm1075_vm1, %v640_v33 }
 0x1bb   : > { %1905 = vmatmul.msk.f32.gmra.mxu2 %vm1075_vm1, %v670_v36  ;;  %v646_v36 = vld [vmem:[%s3217_s3 + $0x98] sm:$0xff] }
 0x1bc   : > { %1922 = vmatmul.msk.f32.gmra.mxu3 %vm1075_vm1, %v687_v37 }
 0x1c2   : > { %1876 = vmatmul.msk.f32.gmra.mxu0 %vm1075_vm1, %v641_v40 }
 0x1c3   : > { %1906 = vmatmul.msk.f32.gmra.mxu2 %vm1075_vm1, %v671_v42 }
 0x1c4   : > { %1923 = vmatmul.msk.f32.gmra.mxu3 %vm1075_vm1, %v688_v43 }
 0x1ca   : > { %1877 = vmatmul.msk.f32.gmra.mxu0 %vm1075_vm1, %v642_v45  ;;  %v647_v45 = vld [vmem:[%s3217_s3 + $0xa0] sm:$0xff] }
 0x1cb   : > { %1907 = vmatmul.msk.f32.gmra.mxu2 %vm1075_vm1, %v672_v46 }
 0x1cc   : > { %1924 = vmatmul.msk.f32.gmra.mxu3 %vm1075_vm1, %v689_v50 }
 0x1cf   : > { %v2902_v53 = vpop.f32.mrf.mxu0 }
 0x1d0   : > { %v2907_v55 = vpop.f32.mrf.mxu1 }
 0x1d2   : > { %1878 = vmatmul.msk.f32.gmra.mxu0 %vm1075_vm1, %v643_v54 }
 0x1d3   : > { %1908 = vmatmul.msk.f32.gmra.mxu2 %vm1075_vm1, %v673_v56 }
 0x1d4   : > { %1925 = vmatmul.msk.f32.gmra.mxu3 %vm1075_vm1, %v690_v59 }
 0x1d6   : > { %v1378_v0 = vpop.f32.mrf.mxu2 }
 0x1d7   : > { %v1429_v1 = vpop.f32.mrf.mxu3  ;;  %v2918_v2 = vpop.f32.mrf.mxu0  ;;  %v1379_v14 = vadd.f32 %v1378_v0, %v908_v11 }
 0x1d8   : > { %v1430_v7 = vadd.f32 %v1429_v1, %v993_v63  ;;  %v2923_v8 = vpop.f32.mrf.mxu1 }
 0x1d9   : > { %v1510_v28 = vmax.f32 %v1379_v14, 0.0 }
 0x1da   : > { %v1527_v35 = vmax.f32 %v1430_v7, 0.0  ;;  %1879 = vmatmul.msk.f32.gmra.mxu0 %vm1075_vm1, %v644_v5 }
 0x1dc   : > { %1626 = vmatpush.msrb.mxu3 %v1527_v35 }
 0x1de   : > { %v1381_v13 = vpop.f32.mrf.mxu2 }
 0x1df   : > { %v1382_v16 = vadd.f32 %v1381_v13, %v913_v9  ;;  %v2926_v17 = vpop.f32.mrf.mxu3  ;;  %v2928_v19 = vpop.f32.mrf.mxu0 }
 0x1e0   : > { %3243 = vst [vmem:[#allocation12_spill] sm:$0xff] %v2926_v17  ;;  %v1357_v23 = vpop.f32.mrf.mxu1 }
 0x1e1   : > { %v1511_v24 = vmax.f32 %v1382_v16, 0.0 }
 0x1e2   : > { %1880 = vmatmul.msk.f32.gmra.mxu0 %vm1075_vm1, %v645_v22  ;;  %v903_v22 = vpop.permute.xlu0 %902 }
 0x1e3   : > { %1600 = vmatpush.msrb.mxu2 %v1511_v24 }
 0x1e5   : > { %1601 = vmatpush.msrb.mxu2 %v1510_v28 }
 0x1e6   : > { %v2934_v29 = vpop.f32.mrf.mxu2 }
 0x1e7   : > { %3244 = vst [vmem:[#allocation13_spill] sm:$0xff] %v2934_v29  ;;  %v2936_v30 = vpop.f32.mrf.mxu3  ;;  %v2938_v33 = vpop.f32.mrf.mxu0 }
 0x1e8   : > { %3245 = vst [vmem:[#allocation14_spill] sm:$0xff] %v2936_v30  ;;  %v1360_v37 = vpop.f32.mrf.mxu1 }
 0x1e9   : > { %v1361_v31 = vadd.f32 %v1360_v37, %v2895_v51 }
 0x1ea   : > { %1881 = vmatmul.msk.f32.gmra.mxu0 %vm1075_vm1, %v646_v36  ;;  %v2998_v37 = vpop.permute.xlu0 %977 }
 0x1ee   : > { %v2944_v40 = vpop.f32.mrf.mxu2 }
 0x1ef   : > { %3246 = vst [vmem:[#allocation15_spill] sm:$0xff] %v2944_v40  ;;  %v2946_v42 = vpop.f32.mrf.mxu3  ;;  %v2948_v43 = vpop.f32.mrf.mxu0 }
 0x1f0   : > { %3247 = vst [vmem:[#allocation16_spill] sm:$0xff] %v2946_v42  ;;  %v1363_v46 = vpop.f32.mrf.mxu1 }
 0x1f2   : > { %1882 = vmatmul.msk.f32.gmra.mxu0 %vm1075_vm1, %v647_v45 }
 0x1f6   : > { %v2954_v50 = vpop.f32.mrf.mxu2 }
 0x1f7   : > { %3248 = vst [vmem:[#allocation17_spill] sm:$0xff] %v2954_v50  ;;  %v2956_v54 = vpop.f32.mrf.mxu3  ;;  %v2958_v56 = vpop.f32.mrf.mxu0 }
 0x1f8   : > { %3249 = vst [vmem:[#allocation18_spill] sm:$0xff] %v2956_v54  ;;  %v1366_v59 = vpop.f32.mrf.mxu1 }
 0x1f9   : > { %v1367_v30 = vadd.f32 %v1366_v59, %v888_v61  ;;  %v2988_v61 = vpop.permute.xlu1 %987 }
 0x1fb   : > { %v1506_v32 = vmax.f32 %v1367_v30, 0.0 }
 0x1fe   : > { %v2960_v63 = vpop.f32.mrf.mxu2 }
 0x1ff   : > { %3250 = vst [vmem:[#allocation19_spill] sm:$0xff] %v2960_v63  ;;  %v2962_v0 = vpop.f32.mrf.mxu3  ;;  %v2964_v1 = vpop.f32.mrf.mxu0 }
 0x200   : > { %3251 = vst [vmem:[#allocation20_spill] sm:$0xff] %v2962_v0  ;;  %v1369_v5 = vpop.f32.mrf.mxu1  ;;  %v1364_v0 = vadd.f32 %v1363_v46, %v2879_v44  ;;  %v1504_v44 = vmax.f32 %v1361_v31, 0.0 }
 0x201   : > { %v1370_v45 = vadd.f32 %v1369_v5, %v893_v62  ;;  %v3000_v31 = vpop.permute.xlu1 %972  ;;  %v3010_v5 = vpop.permute.xlu0 %967 }
 0x202   : > { %v1505_v62 = vmax.f32 %v1364_v0, 0.0 }
 0x206   : > { %v2966_v7 = vpop.f32.mrf.mxu2 }
 0x207   : > { %v2968_v35 = vpop.f32.mrf.mxu3  ;;  %v2970_v9 = vpop.f32.mrf.mxu0 }
 0x208   : > { %3252 = vst [vmem:[#allocation21_spill] sm:$0xff] %v2968_v35  ;;  %v1372_v11 = vpop.f32.mrf.mxu1  ;;  %v1507_v35 = vmax.f32 %v1370_v45, 0.0 }
 0x209   : > { %v1373_v28 = vadd.f32 %v1372_v11, %v2899_v52  ;;  %v1358_v52 = vadd.f32 %v1357_v23, %v2890_v48  ;;  %v983_v48 = vpop.permute.xlu2 %982  ;;  %v3012_v11 = vpop.permute.xlu1 %1067 }
 0x20a   : > { %v3020_v45 = vpop.permute.xlu0 %1062 }
 0x20b   : > { %v1508_v42 = vmax.f32 %v1373_v28, 0.0  ;;  %v1503_v59 = vmax.f32 %v1358_v52, 0.0  ;;  %3258 = vst [vmem:[#allocation27_spill] sm:$0xff] %v3020_v45 }
 0x20e   : > { %v2972_v13 = vpop.f32.mrf.mxu2 }
 0x20f   : > { %v2974_v14 = vpop.f32.mrf.mxu3  ;;  %v2976_v16 = vpop.f32.mrf.mxu0 }
 0x210   : > { %3253 = vst [vmem:[#allocation22_spill] sm:$0xff] %v2974_v14  ;;  %v1375_v24 = vpop.f32.mrf.mxu1 }
 0x211   : > { %v1376_v36 = vadd.f32 %v1375_v24, %v903_v22  ;;  %v3022_v52 = vpop.permute.xlu1 %957 }
 0x213   : > { %v1509_v17 = vmax.f32 %v1376_v36, 0.0 }
 0x215   : > { %1602 = vmatpush.msrb.mxu2 %v1509_v17  ;;  %v1355_v17 = vadd.f32 %v2923_v8, %v2855_v34 }
 0x216   : > { %v2979_v54 = vpop.f32.mrf.mxu2 }
 0x217   : > { %v2982_v21 = vpop.f32.mrf.mxu3  ;;  %1603 = vmatpush.msrb.mxu2 %v1508_v42  ;;  %v2984_v14 = vpop.f32.mrf.mxu0  ;;  %v1352_v42 = vadd.f32 %v2907_v55, %v2871_v41  ;;  %v1502_v23 = vmax.f32 %v1355_v17, 0.0 }
 0x218   : > { %3254 = vst [vmem:[#allocation23_spill] sm:$0xff] %v2982_v21  ;;  %v3006_v55 = vpop.permute.xlu2 %1072 }
 0x219   : > { %1604 = vmatpush.msrb.mxu2 %v1507_v35 }
 0x21b   : > { %1605 = vmatpush.msrb.mxu2 %v1506_v32  ;;  %v1501_v32 = vmax.f32 %v1352_v42, 0.0 }
 0x21d   : > { %1606 = vmatpush.msrb.mxu2 %v1505_v62 }
 0x21e   : > { %v2992_v46 = vpop.f32.mrf.mxu2 }
 0x21f   : > { %v2996_v51 = vpop.f32.mrf.mxu3  ;;  %1607 = vmatpush.msrb.mxu2 %v1504_v44  ;;  %v1318_v30 = vpop.f32.mrf.mxu0 }
 0x220   : > { %3255 = vst [vmem:[#allocation24_spill] sm:$0xff] %v2996_v51  ;;  %v3016_v24 = vpop.permute.xlu2 %962 }
 0x221   : > { %1608 = vmatpush.msrb.mxu2 %v1503_v59  ;;  %v3028_v59 = vpop.permute.xlu0 %952 }
 0x223   : > { %1609 = vmatpush.msrb.mxu2 %v1502_v23  ;;  %v3030_v23 = vpop.permute.xlu1 %1052 }
 0x224   : > { %3261 = vst [vmem:[#allocation30_spill] sm:$0xff] %v3030_v23 }
 0x225   : > { %1610 = vmatpush.msrb.mxu2 %v1501_v32 }
 0x226   : > { %v3002_v34 = vpop.f32.mrf.mxu2 }
 0x227   : > { %v3004_v8 = vpop.f32.mrf.mxu3  ;;  %v1321_v41 = vpop.f32.mrf.mxu0 }
 0x228   : > { %3256 = vst [vmem:[#allocation25_spill] sm:$0xff] %v3004_v8  ;;  %v3026_v17 = vpop.permute.xlu2 %1057 }
 0x229   : > { %3260 = vst [vmem:[#allocation29_spill] sm:$0xff] %v3026_v17  ;;  %v3040_v50 = vpop.permute.xlu0 %1047 }
 0x22b   : > { %v3042_v23 = vpop.permute.xlu1 %942 }
 0x22e   : > { %v3008_v0 = vpop.f32.mrf.mxu2 }
 0x22f   : > { %v1324_v35 = vpop.f32.mrf.mxu0  ;;  %v3014_v22 = vpop.f32.mrf.mxu3 }
 0x230   : > { %3257 = vst [vmem:[#allocation26_spill] sm:$0xff] %v3014_v22  ;;  %v3034_v8 = vpop.permute.xlu2 %947  ;;  %v1325_v40 = vadd.f32 %v1324_v35, %v2811_v20 }
 0x236   : > { %v3018_v28 = vpop.f32.mrf.mxu2 }
 0x237   : > { %v1327_v36 = vpop.f32.mrf.mxu0  ;;  %v3024_v62 = vpop.f32.mrf.mxu3 }
 0x238   : > { %3259 = vst [vmem:[#allocation28_spill] sm:$0xff] %v3024_v62  ;;  %v1328_v27 = vadd.f32 %v1327_v36, %v2795_v15  ;;  %v1319_v15 = vadd.f32 %v1318_v30, %v2764_v6  ;;  %v3050_v20 = vpop.permute.xlu2 %1042  ;;  %v3058_v6 = vpop.permute.xlu0 %937  ;;  %v1304_v36 = vadd.f32 %v2958_v56, %v2757_v3  ;;  %v1298_v3 = vadd.f32 %v2938_v33, %v2727_v58 }
 0x239   : > { %v1292_v33 = vadd.f32 %v2918_v2, %v2690_v47 }
 0x23a   : > { %v1493_v17 = vmax.f32 %v1328_v27, 0.0  ;;  %v1490_v27 = vmax.f32 %v1319_v15, 0.0  ;;  %v1485_v56 = vmax.f32 %v1304_v36, 0.0  ;;  %v3271_v36 = vld [vmem:[#allocation15_spill] sm:$0xff] }
 0x23b   : > { %v1481_v47 = vmax.f32 %v1292_v33, 0.0 }
 0x23e   : > { %v1417_v44 = vpop.f32.mrf.mxu2 }
 0x23f   : > { %v1330_v42 = vpop.f32.mrf.mxu0  ;;  %v3032_v32 = vpop.f32.mrf.mxu3 }
 0x240   : > { %3262 = vst [vmem:[#allocation31_spill] sm:$0xff] %v3032_v32  ;;  %v1331_v29 = vadd.f32 %v1330_v42, %v2828_v25  ;;  %v1322_v32 = vadd.f32 %v1321_v41, %v2806_v18  ;;  %v1313_v18 = vadd.f32 %v2976_v16, %v2782_v10  ;;  %v3065_v10 = vpop.permute.xlu1 %1037  ;;  %v1406_v42 = vadd.f32 %v2992_v46, %v3028_v59 }
 0x241   : > { %v1400_v46 = vadd.f32 %v2972_v13, %v3042_v23 }
 0x242   : > { %v1494_v62 = vmax.f32 %v1331_v29, 0.0  ;;  %v1491_v29 = vmax.f32 %v1322_v32, 0.0  ;;  %v1519_v59 = vmax.f32 %v1406_v42, 0.0 }
 0x246   : > { %v1420_v21 = vpop.f32.mrf.mxu2 }
 0x247   : > { %v1333_v51 = vpop.f32.mrf.mxu0  ;;  %v3045_v45 = vpop.f32.mrf.mxu3  ;;  %v1421_v16 = vadd.f32 %v1420_v21, %v2998_v37  ;;  %v1415_v21 = vadd.f32 %v3018_v28, %v3010_v5  ;;  %v1409_v28 = vadd.f32 %v3002_v34, %v3022_v52  ;;  %v1403_v34 = vadd.f32 %v2979_v54, %v3034_v8  ;;  %v1544_v54 = vld [vmem:[%s3263_s23] sm:$0xff] }
 0x248   : > { %v1334_v38 = vadd.f32 %v1333_v51, %v2831_v26  ;;  %v1492_v26 = vmax.f32 %v1325_v40, 0.0  ;;  %v1310_v51 = vadd.f32 %v2970_v9, %v2733_v60  ;;  %v3083_v5 = vpop.permute.xlu0 %1032  ;;  %v1397_v8 = vadd.f32 %v2966_v7, %v3058_v6  ;;  %v3268_v7 = vld [vmem:[#allocation17_spill] sm:$0xff] }
 0x249   : > { %v1524_v37 = vmax.f32 %v1421_v16, 0.0  ;;  %v1522_v58 = vmax.f32 %v1415_v21, 0.0  ;;  %v1520_v52 = vmax.f32 %v1409_v28, 0.0  ;;  %v3269_v16 = vld [vmem:[#allocation30_spill] sm:$0xff] }
 0x24a   : > { %v1495_v22 = vmax.f32 %v1334_v38, 0.0  ;;  %v1316_v38 = vadd.f32 %v2984_v14, %v2787_v12  ;;  %v1307_v12 = vadd.f32 %v2964_v1, %v2759_v4  ;;  %v1488_v14 = vmax.f32 %v1313_v18, 0.0 }
 0x24b   : > { %v1301_v4 = vadd.f32 %v2948_v43, %v2698_v49  ;;  %v1295_v49 = vadd.f32 %v2928_v19, %v2663_v39  ;;  %v1289_v19 = vadd.f32 %v2902_v53, %v2723_v57 }
 0x24c   : > { %1574 = vmatpush.msrb.mxu1 %v1495_v22  ;;  %v1489_v41 = vmax.f32 %v1316_v38, 0.0  ;;  %v1486_v1 = vmax.f32 %v1307_v12, 0.0 }
 0x24d   : > { %v1484_v43 = vmax.f32 %v1301_v4, 0.0  ;;  %v1482_v15 = vmax.f32 %v1295_v49, 0.0  ;;  %v1480_v57 = vmax.f32 %v1289_v19, 0.0  ;;  %v3272_v4 = vld [vmem:[#allocation26_spill] sm:$0xff]  ;;  %v3275_v49 = vld [vmem:[#allocation13_spill] sm:$0xff] }
 0x24e   : > { %v1423_v63 = vpop.f32.mrf.mxu2  ;;  %1575 = vmatpush.msrb.mxu1 %v1494_v62  ;;  %v1487_v62 = vmax.f32 %v1310_v51, 0.0 }
 0x24f   : > { %v3047_v25 = vpop.f32.mrf.mxu0  ;;  %v1424_v40 = vadd.f32 %v1423_v63, %v983_v48  ;;  %v1474_v60 = vpop.f32.mrf.mxu3  ;;  %v1418_v63 = vadd.f32 %v1417_v44, %v3000_v31  ;;  %v1412_v31 = vadd.f32 %v3008_v0, %v3016_v24  ;;  %v1483_v0 = vmax.f32 %v1298_v3, 0.0 }
 0x250   : > { %1576 = vmatpush.msrb.mxu1 %v1493_v17  ;;  %v933_v48 = vpop.permute.xlu2 %932  ;;  %v928_v24 = vpop.permute.xlu1 %927  ;;  %v1475_v53 = vadd.f32 %v1474_v60, %v3012_v11  ;;  %v3266_v11 = vld [vmem:[#allocation29_spill] sm:$0xff] }
 0x251   : > { %v1523_v17 = vmax.f32 %v1418_v63, 0.0  ;;  %v1521_v32 = vmax.f32 %v1412_v31, 0.0  ;;  %v923_v23 = vpop.permute.xlu0 %922  ;;  %v1391_v6 = vadd.f32 %v3268_v7, %v928_v24  ;;  %v3277_v24 = vld [vmem:[#allocation10_spill] sm:$0xff] }
 0x252   : > { %1577 = vmatpush.msrb.mxu1 %v1492_v26 }
 0x253   : > { %v1514_v28 = vmax.f32 %v1391_v6, 0.0  ;;  %v3286_v6 = vld [vmem:[#allocation16_spill] sm:$0xff] }
 0x254   : > { %1578 = vmatpush.msrb.mxu1 %v1491_v29  ;;  %v1518_v29 = vmax.f32 %v1403_v34, 0.0  ;;  %v3279_v34 = vld [vmem:[#allocation9_spill] sm:$0xff] }
 0x256   : > { %v1426_v35 = vpop.f32.mrf.mxu2  ;;  %1579 = vmatpush.msrb.mxu1 %v1490_v27  ;;  %v3265_v27 = vld [vmem:[#allocation19_spill] sm:$0xff] }
 0x257   : > { %v1427_v30 = vadd.f32 %v1426_v35, %v2988_v61  ;;  %v3061_v22 = vpop.f32.mrf.mxu0  ;;  %v1525_v61 = vmax.f32 %v1424_v40, 0.0  ;;  %v1477_v39 = vpop.f32.mrf.mxu3  ;;  %v1394_v51 = vadd.f32 %v3265_v27, %v933_v48  ;;  %v3267_v35 = vld [vmem:[#allocation31_spill] sm:$0xff]  ;;  %v1545_v27 = vld [vmem:[%s3263_s23 + $0x8] sm:$0xff] }
 0x258   : > { %1580 = vmatpush.msrb.mxu1 %v1489_v41  ;;  %v3095_v2 = vpop.permute.xlu2 %1027  ;;  %v1478_v26 = vadd.f32 %v1477_v39, %v3006_v55  ;;  %v3264_v55 = vld [vmem:[#allocation27_spill] sm:$0xff]  ;;  %v1517_v41 = vmax.f32 %v1400_v46, 0.0  ;;  %v1469_v40 = vadd.f32 %v3267_v35, %v3266_v11  ;;  %v1023_v12 = vpop.permute.xlu1 %1022  ;;  %v3278_v39 = vld [vmem:[#allocation24_spill] sm:$0xff]  ;;  %v3285_v11 = vld [vmem:[#allocation18_spill] sm:$0xff] }
 0x259   : > { %v1526_v9 = vmax.f32 %v1427_v30, 0.0  ;;  %v1472_v18 = vadd.f32 %v3045_v45, %v3264_v55  ;;  %v1542_v30 = vmax.f32 %v1475_v53, 0.0  ;;  %v3270_v45 = vld [vmem:[#allocation28_spill] sm:$0xff]  ;;  %v1515_v63 = vmax.f32 %v1394_v51, 0.0 }
 0x25a   : > { %1581 = vmatpush.msrb.mxu1 %v1488_v14  ;;  %v1543_v13 = vmax.f32 %v1478_v26, 0.0  ;;  %v1516_v14 = vmax.f32 %v1397_v8, 0.0  ;;  %v1466_v60 = vadd.f32 %v3270_v45, %v3269_v16  ;;  %v1540_v21 = vmax.f32 %v1469_v40, 0.0  ;;  %v1018_v26 = vpop.permute.xlu0 %1017 }
 0x25b   : > { %1627 = vmatpush.msrb.mxu3 %v1526_v9  ;;  %v1541_v9 = vmax.f32 %v1472_v18, 0.0  ;;  %v1457_v19 = vadd.f32 %v3278_v39, %v3065_v10 }
 0x25c   : > { %1582 = vmatpush.msrb.mxu1 %v1487_v62  ;;  %v1388_v62 = vadd.f32 %v3271_v36, %v923_v23 }
 0x25d   : > { %1628 = vmatpush.msrb.mxu3 %v1525_v61 }
 0x25e   : > { %1583 = vmatpush.msrb.mxu1 %v1486_v1  ;;  %v1463_v1 = vadd.f32 %v3272_v4, %v3040_v50 }
 0x25f   : > { %1629 = vmatpush.msrb.mxu3 %v1524_v37  ;;  %v3079_v44 = vpop.f32.mrf.mxu0  ;;  %v3273_v37 = vld [vmem:[#allocation8_spill] sm:$0xff] }
 0x260   : > { %1584 = vmatpush.msrb.mxu1 %v1485_v56  ;;  %v918_v48 = vpop.permute.xlu2 %917  ;;  %v3274_v56 = vld [vmem:[#allocation11_spill] sm:$0xff]  ;;  %v1343_v50 = vadd.f32 %v3079_v44, %v3277_v24  ;;  %v1013_v10 = vpop.permute.xlu1 %1012 }
 0x261   : > { %1630 = vmatpush.msrb.mxu3 %v1523_v17  ;;  %v1548_v17 = vld [vmem:[%s3263_s23 + $0x20] sm:$0xff]  ;;  %v3280_v44 = vld [vmem:[#allocation23_spill] sm:$0xff]  ;;  %v1442_v35 = vadd.f32 %v3285_v11, %v1013_v10 }
 0x262   : > { %1585 = vmatpush.msrb.mxu1 %v1484_v43  ;;  %v1385_v43 = vadd.f32 %v3275_v49, %v918_v48  ;;  %v1454_v46 = vadd.f32 %v3280_v44, %v3083_v5  ;;  %v1498_v53 = vmax.f32 %v1343_v50, 0.0  ;;  %v3283_v5 = vld [vmem:[#allocation21_spill] sm:$0xff]  ;;  %v1003_v7 = vpop.permute.xlu0 %1002 }
 0x263   : > { %1631 = vmatpush.msrb.mxu3 %v1522_v58  ;;  %v3276_v58 = vld [vmem:[#allocation25_spill] sm:$0xff]  ;;  %v1448_v18 = vadd.f32 %v3283_v5, %v1023_v12 }
 0x264   : > { %1586 = vmatpush.msrb.mxu1 %v1483_v0  ;;  %v1460_v33 = vadd.f32 %v3276_v58, %v3050_v20  ;;  %v1539_v0 = vmax.f32 %v1466_v60, 0.0  ;;  %v1512_v20 = vmax.f32 %v1385_v43, 0.0  ;;  %v1531_v60 = vmax.f32 %v1442_v35, 0.0 }
 0x265   : > { %1632 = vmatpush.msrb.mxu3 %v1521_v32  ;;  %v1513_v32 = vmax.f32 %v1388_v62, 0.0  ;;  %v1533_v40 = vmax.f32 %v1448_v18, 0.0  ;;  %v1549_v62 = vld [vmem:[%s3263_s23 + $0x28] sm:$0xff] }
 0x266   : > { %1587 = vmatpush.msrb.mxu1 %v1482_v15  ;;  %v1538_v15 = vmax.f32 %v1463_v1, 0.0  ;;  %v1554_v1 = vld [vmem:[%s3263_s23 + $0x50] sm:$0x3] }
 0x267   : > { %1633 = vmatpush.msrb.mxu3 %v1520_v52  ;;  %v1345_v38 = vpop.f32.mrf.mxu0  ;;  %v1340_v52 = vadd.f32 %v3061_v22, %v3279_v34  ;;  %v1546_v22 = vld [vmem:[%s3263_s23 + $0x10] sm:$0xff] }
 0x268   : > { %1588 = vmatpush.msrb.mxu1 %v1481_v47  ;;  %v1346_v3 = vadd.f32 %v1345_v38, %v3273_v37  ;;  %v3281_v38 = vld [vmem:[#allocation7_spill] sm:$0xff]  ;;  %v1008_v12 = vpop.permute.xlu2 %1007  ;;  %v998_v45 = vpop.permute.xlu1 %997  ;;  %v1547_v37 = vld [vmem:[%s3263_s23 + $0x18] sm:$0xff] }
 0x269   : > { %1634 = vmatpush.msrb.mxu3 %v1519_v59  ;;  %v1537_v59 = vmax.f32 %v1460_v33, 0.0  ;;  %v1497_v55 = vmax.f32 %v1340_v52, 0.0 }
 0x26a   : > { %1589 = vmatpush.msrb.mxu1 %v1480_v57  ;;  %v1499_v47 = vmax.f32 %v1346_v3, 0.0  ;;  %v1337_v57 = vadd.f32 %v3047_v25, %v3281_v38  ;;  %v1552_v25 = vld [vmem:[%s3263_s23 + $0x40] sm:$0x3]  ;;  %v1553_v3 = vld [vmem:[%s3263_s23 + $0x48] sm:$0x3]  ;;  %v1567_v50 = vpop.permute.xlu0 %1566 }
 0x26b   : > { %1635 = vmatpush.msrb.mxu3 %v1518_v29  ;;  %1590 = vmatmul.f32.vlgmr.msrb.gmra.mxu1 %v1544_v54  ;;  %v3282_v54 = vld [vmem:[#allocation22_spill] sm:$0xff]  ;;  %v1536_v29 = vmax.f32 %v1457_v19, 0.0 }
 0x26c   : > { %1652 = vmatpush.msra.mxu1 %v1543_v13  ;;  %v1451_v8 = vadd.f32 %v3282_v54, %v3095_v2  ;;  %v1535_v13 = vmax.f32 %v1454_v46, 0.0  ;;  %v1496_v23 = vmax.f32 %v1337_v57, 0.0  ;;  %v3284_v2 = vld [vmem:[#allocation20_spill] sm:$0xff] }
 0x26d   : > { %1636 = vmatpush.msrb.mxu3 %v1517_v41  ;;  %v1445_v51 = vadd.f32 %v3284_v2, %v1018_v26 }
 0x26e   : > { %1653 = vmatpush.msra.mxu1 %v1542_v30  ;;  %v1534_v41 = vmax.f32 %v1451_v8, 0.0  ;;  %v1550_v30 = vld [vmem:[%s3263_s23 + $0x30] sm:$0xff] }
 0x26f   : > { %1637 = vmatpush.msrb.mxu3 %v1516_v14  ;;  %v1348_v61 = vpop.f32.mrf.mxu0  ;;  %v1439_v14 = vadd.f32 %v3286_v6, %v1008_v12  ;;  %v1532_v16 = vmax.f32 %v1445_v51, 0.0 }
 0x270   : > { %v1349_v31 = vadd.f32 %v1348_v61, %v3274_v56  ;;  %1654 = vmatpush.msra.mxu1 %v1541_v9  ;;  %v3287_v9 = vld [vmem:[#allocation14_spill] sm:$0xff]  ;;  %v3288_v61 = vld [vmem:[#allocation12_spill] sm:$0xff]  ;;  %v1562_v43 = vpop.permute.xlu2 %1561 }
 0x271   : > { %1638 = vmatpush.msrb.mxu3 %v1515_v63  ;;  %v1436_v36 = vadd.f32 %v3287_v9, %v1003_v7  ;;  %v1530_v63 = vmax.f32 %v1439_v14, 0.0  ;;  %v1433_v48 = vadd.f32 %v3288_v61, %v998_v45  ;;  %v1551_v56 = vld [vmem:[%s3263_s23 + $0x38] sm:$0xff] }
 0x272   : > { %v1500_v42 = vmax.f32 %v1349_v31, 0.0  ;;  %1655 = vmatpush.msra.mxu1 %v1540_v21  ;;  %v1555_v31 = vld [vmem:[%s3263_s23 + $0x58] sm:$0x3] }
 0x273   : > { %1639 = vmatpush.msrb.mxu3 %v1514_v28  ;;  %1593 = vmatmul.f32.gmra.mxu1 %v1548_v17  ;;  %v1529_v4 = vmax.f32 %v1436_v36, 0.0  ;;  %v1528_v21 = vmax.f32 %v1433_v48, 0.0 }
 0x274   : > { %1656 = vmatpush.msra.mxu1 %v1539_v0  ;;  %1611 = vmatpush.msrb.mxu2 %v1500_v42 }
 0x275   : > { %1640 = vmatpush.msrb.mxu3 %v1513_v32 }
 0x276   : > { %1657 = vmatpush.msra.mxu1 %v1538_v15  ;;  %1612 = vmatpush.msrb.mxu2 %v1499_v47  ;;  %v1572_v47 = vpop.permute.xlu1 %1571 }
 0x277   : > { %1641 = vmatpush.msrb.mxu3 %v1512_v20 }
 0x278   : > { %1658 = vmatpush.msra.mxu1 %v1537_v59  ;;  %1613 = vmatpush.msrb.mxu2 %v1498_v53 }
 0x279   : > { %1642 = vmatmul.f32.vlgmr.msrb.gmra.mxu3 %v1546_v22 }
 0x27a   : > { %1659 = vmatpush.msra.mxu1 %v1536_v29  ;;  %1614 = vmatpush.msrb.mxu2 %v1497_v55 }
 0x27b   : > { %1596 = vmatmul.f32.gmra.mxu1 %v1552_v25 }
 0x27c   : > { %1660 = vmatpush.msra.mxu1 %v1535_v13  ;;  %1615 = vmatpush.msrb.mxu2 %v1496_v23 }
 0x27d   : > { %1616 = vmatmul.f32.vlgmr.msrb.gmra.mxu2 %v1545_v27 }
 0x27e   : > { %1661 = vmatpush.msra.mxu1 %v1534_v41 }
 0x280   : > { %1662 = vmatpush.msra.mxu1 %v1533_v40 }
 0x281   : > { %1645 = vmatmul.f32.gmra.mxu3 %v1550_v30 }
 0x282   : > { %1663 = vmatpush.msra.mxu1 %v1532_v16 }
 0x284   : > { %1664 = vmatpush.msra.mxu1 %v1531_v60 }
 0x285   : > { %1619 = vmatmul.f32.gmra.mxu2 %v1549_v62 }
 0x286   : > { %1665 = vmatpush.msra.mxu1 %v1530_v63 }
 0x288   : > { %1666 = vmatpush.msra.mxu1 %v1529_v4 }
 0x289   : > { %1648 = vmatmul.f32.gmra.mxu3 %v1554_v1 }
 0x28a   : > { %1667 = vmatpush.msra.mxu1 %v1528_v21 }
 0x28b   : > { %1668 = vmatmul.f32.vlgmr.msra.gmra.mxu1 %v1547_v37 }
 0x28d   : > { %1622 = vmatmul.f32.gmra.mxu2 %v1553_v3 }
 0x293   : > { %1671 = vmatmul.f32.gmra.mxu1 %v1551_v56 }
 0x29b   : > { %1674 = vmatmul.f32.gmra.mxu1 %v1555_v31 }
 0x2e8   : > { %v1591_v17 = vpop.f32.mrf.mxu1 }
 0x2e9   : > { %v1592_v0 = vadd.f32 %v1591_v17, %v1562_v43 }
 0x2f0   : > { %v1594_v49 = vpop.f32.mrf.mxu1 }
 0x2f1   : > { %v1595_v19 = vadd.f32 %v1594_v49, %v1567_v50 }
 0x2f8   : > { %v1597_v28 = vpop.f32.mrf.mxu1 }
 0x2f9   : > { %v1598_v46 = vadd.f32 %v1597_v28, %v1572_v47 }
 0x2fc   : > { %v1643_v33 = vpop.f32.mrf.mxu3 }
 0x300   : > { %v1617_v58 = vpop.f32.mrf.mxu2 }
 0x301   : > { %v1618_v24 = vadd.f32 %v1617_v58, %v1592_v0 }
 0x303   : > { %v1644_v42 = vadd.f32 %v1643_v33, %v1618_v24 }
 0x304   : > { %v1646_v34 = vpop.f32.mrf.mxu3 }
 0x308   : > { %v1669_v32 = vpop.f32.mrf.mxu1  ;;  %v1620_v39 = vpop.f32.mrf.mxu2 }
 0x309   : > { %v1670_v15 = vadd.f32 %v1669_v32, %v1644_v42  ;;  %v1621_v52 = vadd.f32 %v1620_v39, %v1595_v19 }
 0x30b   : > { %1678 = vst [vmem:[%s449_s17] sm:$0xff] %v1670_v15  ;;  %v1647_v20 = vadd.f32 %v1646_v34, %v1621_v52 }
 0x30c   : > { %v1649_v57 = vpop.f32.mrf.mxu3 }
 0x310   : > { %v1672_v26 = vpop.f32.mrf.mxu1  ;;  %v1623_v44 = vpop.f32.mrf.mxu2 }
 0x311   : > { %v1673_v59 = vadd.f32 %v1672_v26, %v1647_v20  ;;  %v1624_v38 = vadd.f32 %v1623_v44, %v1598_v46 }
 0x312   : > { %v1724_v54 = vld [vmem:[%s449_s17] sm:$0xff] (%p2344_p11) }
 0x313   : > { %1679 = vst [vmem:[%s449_s17 + $0x8] sm:$0xff] %v1673_v59  ;;  %v1650_v53 = vadd.f32 %v1649_v57, %v1624_v38 }
 0x314   : > { %1725 = vst [vmem:[%s1691_s21] sm:$0xff] (%p2344_p11), %v1724_v54 }
 0x317   : > { %1687 = sbr.rel (!%p2344_p11) target bundleno = 804 (0x324), region = 128 }
 0x318   : > { %v1675_v22 = vpop.f32.mrf.mxu1 }
 0x319   : > { %v1676_v10 = vadd.f32 %v1675_v22, %v1650_v53 }
 0x31a   : > { %v1726_v8 = vld [vmem:[%s449_s17 + $0x8] sm:$0xff] (%p2344_p11) }
 0x31b   : > { %1680 = vst [vmem:[%s449_s17 + $0x10] sm:$0x3] %v1676_v10 }
 0x31c   : > { %1727 = vst [vmem:[%s1691_s21 + $0x10] sm:$0xff] %v1726_v8 }
 0x322   : > { %v1728_v29 = vld [vmem:[%s449_s17 + $0x10] sm:$0xff] }
 0x323   : > { %1729 = vst [vmem:[%s1691_s21 + $0x20] sm:$0xff] %v1728_v29 }
 0x324 PF: > { %s17_s11 = sadd.s32 1, %s2197_s11   ;;  %s3290_s5 = sld [smem:[#allocation5_spill]] }
 0x325   : > { %p14_p5 = scmp.ge.s32.totalorder %s17_s11, 6   ;;  %s3291_s16 = sld [smem:[#allocation6_spill]] }
 0x326   : > { %s3292_s24 = smov %s2161_s25  ;;  %s3293_s25 = smov %s2339_s14 }
 0x327   : > { %s3294_s26 = smov %s2169_s27  ;;  %s3295_s27 = smov %s2342_s7 }
 0x328   : > { %s3296_s28 = smov %s2177_s29  ;;  %s3297_s29 = smov %s2324_s18 }
 0x329   : > { %s3298_s30 = smov %s2189_s9  ;;  %s3299_s8 = smov %s2193_s10 }
 0x32a   : > { %s3300_s9 = smov %s3290_s5  ;;  %16 = sbr.rel (!%p14_p5) target bundleno = 10 (0xa), region = 208 }
 0x32b   : > { %s3301_s10 = smov %s3291_s16 }

</bundles_post_ra>
